<compile_context>
chip_gen: v7x
topology: tpu7x:2x2x1
jax: 0.10.0
libtpu: 0.0.40
codegen_flags: <defaults>
</compile_context>

<pallas_src>
import functools

import jax
import jax.numpy as jnp
import numpy as np
from jax.experimental import pallas as pl
from jax.experimental.pallas import tpu as pltpu


# ----------------------------- host-side weight prep -------------------------

def _banded_3x3(w_hwio, W):
    """(3,3,C,Co) HWIO -> (3, W*C, W*Co), one banded matrix per ky.

    A_ky[wi*C + c, wo*Co + o] = w[ky, kx, c, o] with wi = wo + kx - 1 (0 else),
    so  dense_out[h] = sum_ky padded_rows[h + ky] @ A_ky
    is exactly the SAME-padded 3x3 conv in lane-dense (h, w*C + c) layout
    (out-of-range wi simply has no block -> zero padding on the W boundary).
    """
    mats = []
    for ky in range(3):
        a = jnp.zeros((W * w_hwio.shape[2], W * w_hwio.shape[3]),
                      dtype=w_hwio.dtype)
        for kx in range(3):
            shift = jnp.eye(W, k=-(kx - 1), dtype=w_hwio.dtype)
            a = a + jnp.kron(shift, w_hwio[ky, kx])
        mats.append(a)
    return jnp.stack(mats)


def _blockdiag_1x1(w, W):
    """(C, Co) 1x1 weight -> (W*C, W*Co) block-diagonal for dense layout."""
    return jnp.kron(jnp.eye(W, dtype=w.dtype), w)


def _pack_biases(biases, W):
    """Tile each bias across W (dense layout) and pack all into one (1, T)
    f32 array with 128-lane-aligned segments.  Returns (packed, offsets)."""
    segs, offs, off = [], [], 0
    for b in biases:
        bd = jnp.tile(b.astype(jnp.float32), W)          # (W*Co,)
        n = bd.shape[0]
        pad = (-n) % 128
        if pad:
            bd = jnp.pad(bd, (0, pad))
        segs.append(bd)
        offs.append((off, n))
        off += n + pad
    return jnp.concatenate(segs).reshape(1, off), tuple(offs)


def _pick_batch_tile(N):
    # Fold batch samples into one grid step to amortize ~0.35us/step overhead,
    # but keep >= 2 grid steps when N >= 2 so v7x's second TensorCore has work
    # (the batch grid axis is "parallel").
    if N <= 2:
        return 1
    for bt in range(N // 2, 0, -1):
        if N % bt == 0:
            return bt
    return 1


# ----------------------------- the fused kernel ------------------------------

def _scm_kernel(bias_offs,
                x_ref, y_ref,
                a0_ref, b1_ref, a2_ref, af_ref, c1_ref, c2x_ref, c2h_ref,
                bias_ref,
                out_ref,
                padx_ref, padh_ref):
    f32, bf16 = jnp.float32, jnp.bfloat16
    BT, H = x_ref.shape[0], x_ref.shape[1]

    def bias(i):
        off, n = bias_offs[i]
        return bias_ref[:, off:off + n]                  # (1, n) f32, static slice

    def conv3x3(pad_ref, w_ref, b):
        # 3 accumulating MXU matmuls (one per ky); kx sum + W-boundary zero
        # padding are folded into the banded rhs built on the host.
        acc = jnp.dot(pad_ref[0:H, :].astype(bf16), w_ref[0],
                      preferred_element_type=f32)
        for ky in (1, 2):
            acc = acc + jnp.dot(pad_ref[ky:ky + H, :].astype(bf16), w_ref[ky],
                                preferred_element_type=f32)
        return acc + b

    # Zero only the 2 halo rows of each row-padded scratch buffer (cheap, and
    # safe under a "parallel" grid on multi-TC chips, unlike zero-once).  The
    # interiors are fully overwritten before every use below.
    zx = jnp.zeros((1, padx_ref.shape[1]), f32)
    zh = jnp.zeros((1, padh_ref.shape[1]), f32)
    padx_ref[0:1, :] = zx
    padx_ref[H + 1:H + 2, :] = zx
    padh_ref[0:1, :] = zh
    padh_ref[H + 1:H + 2, :] = zh

    for b in range(BT):                                  # BT is small & static
        x_d = x_ref[b].astype(f32)                       # (H, W*3)   lane-dense
        y_d = y_ref[b].astype(f32)                       # (H, W*c2)  lane-dense

        # ---- main[0]: 3x3 conv (3 -> c4) + bias + relu ----
        padx_ref[1:H + 1, :] = x_d
        h = jnp.maximum(conv3x3(padx_ref, a0_ref, bias(0)), 0.0)   # (H, W*c4)

        # ---- main[1]: 1x1 conv (c4 -> c2) + bias + relu ----
        h = jnp.dot(h.astype(bf16), b1_ref[...],
                    preferred_element_type=f32) + bias(1)
        h = jnp.maximum(h, 0.0)                                    # (H, W*c2)

        # ---- main[2]: 3x3 conv (c2 -> c2) + bias + relu ----
        padh_ref[1:H + 1, :] = h
        h = jnp.maximum(conv3x3(padh_ref, a2_ref, bias(2)), 0.0)   # (H, W*c2)

        # ---- FM: out = y + merge3x3(y * h)   (merge has no relu) ----
        padh_ref[1:H + 1, :] = y_d * h
        h = y_d + conv3x3(padh_ref, af_ref, bias(3))               # (H, W*c2)

        # ---- conv1: 1x1 (c2 -> out_plane-3) + bias + relu ----
        h = jnp.dot(h.astype(bf16), c1_ref[...],
                    preferred_element_type=f32) + bias(4)
        h = jnp.maximum(h, 0.0)                                    # (H, W*(op-3))

        # ---- conv2: 1x1 on cat([x, h]) via split weight (no concat) ----
        out = (jnp.dot(x_d.astype(bf16), c2x_ref[...],
                       preferred_element_type=f32)
               + jnp.dot(h.astype(bf16), c2h_ref[...],
                         preferred_element_type=f32)
               + bias(5))                                          # (H, W*op)

        out_ref[b] = out.astype(out_ref.dtype)                     # lane-dense store


# ----------------------------- wrapper ---------------------------------------

def scm_forward(params, x, y):
    """x: (N, H, W, 3), y: (N, H, W, out_plane//2)  ->  (N, H, W, out_plane)."""
    N, H, W, _ = x.shape
    c2 = y.shape[-1]
    op = 2 * c2
    c4 = op // 4
    bf16 = jnp.bfloat16

    # Lane-dense inputs: (N, H, W*C).
    x_d = x.reshape(N, H, W * 3)
    y_d = y.reshape(N, H, W * c2)

    # Banded / block-diagonal bf16 weights (built once, resident across steps).
    a0 = _banded_3x3(params["m0_w"], W).astype(bf16)            # (3, W*3,  W*c4)
    b1 = _blockdiag_1x1(params["m1_w"].reshape(c4, c2), W).astype(bf16)
    a2 = _banded_3x3(params["m2_w"], W).astype(bf16)            # (3, W*c2, W*c2)
    af = _banded_3x3(params["fm_w"], W).astype(bf16)            # (3, W*c2, W*c2)
    c1 = _blockdiag_1x1(params["c1_w"].reshape(c2, op - 3), W).astype(bf16)
    wc2 = params["c2_w"].reshape(op, op)
    c2x = _blockdiag_1x1(wc2[:3, :], W).astype(bf16)            # (W*3,     W*op)
    c2h = _blockdiag_1x1(wc2[3:, :], W).astype(bf16)            # (W*(op-3),W*op)

    biases_packed, bias_offs = _pack_biases(
        [params["m0_b"], params["m1_b"], params["m2_b"],
         params["fm_b"], params["c1_b"], params["c2_b"]], W)

    BT = _pick_batch_tile(N)
    grid = (N // BT,)

    weights = [a0, b1, a2, af, c1, c2x, c2h, biases_packed]

    def const_map(nd):
        return lambda n: (0,) * nd

    wspecs = [pl.BlockSpec(w.shape, const_map(w.ndim)) for w in weights]

    kernel = functools.partial(_scm_kernel, bias_offs)

    out = pl.pallas_call(
        kernel,
        out_shape=jax.ShapeDtypeStruct((N, H, W * op), x.dtype),
        grid=grid,
        in_specs=[pl.BlockSpec((BT, H, W * 3), lambda n: (n, 0, 0)),
                  pl.BlockSpec((BT, H, W * c2), lambda n: (n, 0, 0))] + wspecs,
        out_specs=pl.BlockSpec((BT, H, W * op), lambda n: (n, 0, 0)),
        scratch_shapes=[pltpu.VMEM((H + 2, W * 3), jnp.float32),   # row-padded x
                        pltpu.VMEM((H + 2, W * c2), jnp.float32)], # row-padded h
        compiler_params=pltpu.CompilerParams(
            dimension_semantics=("parallel",)),
    )(x_d, y_d, *weights)
    return out.reshape(N, H, W, op)


# ----------------------------- parameters ------------------------------------

def init_scm_params(key, out_plane):
    c4, c2 = out_plane // 4, out_plane // 2
    shapes = {
        "m0_w": (3, 3, 3, c4),   "m0_b": (c4,),            # main[0]: 3x3, relu
        "m1_w": (1, 1, c4, c2),  "m1_b": (c2,),            # main[1]: 1x1, relu
        "m2_w": (3, 3, c2, c2),  "m2_b": (c2,),            # main[2]: 3x3, relu
        "fm_w": (3, 3, c2, c2),  "fm_b": (c2,),            # FM.merge: 3x3, no relu
        "c1_w": (1, 1, c2, out_plane - 3), "c1_b": (out_plane - 3,),  # conv1
        "c2_w": (1, 1, out_plane, out_plane), "c2_b": (out_plane,),   # conv2
    }
    params = {}
    for i, (name, shp) in enumerate(sorted(shapes.items())):
        k = jax.random.fold_in(key, i)
        params[name] = 0.1 * jax.random.normal(k, shp, jnp.float32)
    return params


# ----------------------------- pure-JAX reference ----------------------------

def _conv_ref(x, w, b, relu):
    out = jax.lax.conv_general_dilated(
        x, w, window_strides=(1, 1), padding="SAME",
        dimension_numbers=("NHWC", "HWIO", "NHWC"))
    out = out + b
    return jnp.maximum(out, 0.0) if relu else out


def scm_ref(params, x, y):
    h = _conv_ref(x, params["m0_w"], params["m0_b"], True)
    h = _conv_ref(h, params["m1_w"], params["m1_b"], True)
    h = _conv_ref(h, params["m2_w"], params["m2_b"], True)
    h = y + _conv_ref(y * h, params["fm_w"], params["fm_b"], False)
    h = _conv_ref(h, params["c1_w"], params["c1_b"], True)
    cat = jnp.concatenate([x, h], axis=-1)
    return _conv_ref(cat, params["c2_w"], params["c2_b"], False)


if __name__ == "__main__":
    N, H, W = 2, 16, 16
    out_plane = 16                       # -> c4=4, c2=8, out_plane-3=13

    key = jax.random.PRNGKey(0)
    kx_, ky_, kp = jax.random.split(key, 3)
    x = jax.random.normal(kx_, (N, H, W, 3), jnp.float32)               # RGB input
    y = jax.random.normal(ky_, (N, H, W, out_plane // 2), jnp.float32)  # FM side input
    params = init_scm_params(kp, out_plane)

    out = jax.jit(functools.partial(scm_forward, params))(x, y)
    out = jax.block_until_ready(out)
    assert out.shape == (N, H, W, out_plane), out.shape

    ref = jax.block_until_ready(scm_ref(params, x, y))
    # Tolerance sized for bf16 matmul operands (reference is all-f32).
    np.testing.assert_allclose(np.asarray(out), np.asarray(ref),
                               rtol=2e-2, atol=2e-2)
    print("KERNEL_OK")
</pallas_src>

<mosaic_0001>
module attributes {stable_mosaic.version = 11 : i64} {
  func.func @_scm_kernel(%arg0: i32, %arg1: memref<1x16x48xf32, #tpu.memory_space<vmem>>, %arg2: memref<1x16x128xf32, #tpu.memory_space<vmem>>, %arg3: memref<3x48x64xbf16, #tpu.memory_space<vmem>>, %arg4: memref<64x128xbf16, #tpu.memory_space<vmem>>, %arg5: memref<3x128x128xbf16, #tpu.memory_space<vmem>>, %arg6: memref<3x128x128xbf16, #tpu.memory_space<vmem>>, %arg7: memref<128x208xbf16, #tpu.memory_space<vmem>>, %arg8: memref<48x256xbf16, #tpu.memory_space<vmem>>, %arg9: memref<208x256xbf16, #tpu.memory_space<vmem>>, %arg10: memref<1x1024xf32, #tpu.memory_space<vmem>>, %arg11: memref<1x16x256xf32, #tpu.memory_space<vmem>>, %arg12: memref<18x48xf32, #tpu.memory_space<vmem>>, %arg13: memref<18x128xf32, #tpu.memory_space<vmem>>) attributes {dimension_semantics = [#tpu.dimension_semantics<parallel>], iteration_bounds = array<i64: 2>, scalar_prefetch = 0 : i64, scratch_operands = 2 : i64, tpu.core_type = #tpu.core_type<tc>, window_params = [{transform_indices = @transform_0, window_bounds = array<i64: 1, 16, 48>}, {transform_indices = @transform_1, window_bounds = array<i64: 1, 16, 128>}, {pipeline_mode = #tpu.pipeline_mode<synchronous>, transform_indices = @transform_2, window_bounds = array<i64: 3, 48, 64>}, {pipeline_mode = #tpu.pipeline_mode<synchronous>, transform_indices = @transform_3, window_bounds = array<i64: 64, 128>}, {pipeline_mode = #tpu.pipeline_mode<synchronous>, transform_indices = @transform_4, window_bounds = array<i64: 3, 128, 128>}, {pipeline_mode = #tpu.pipeline_mode<synchronous>, transform_indices = @transform_5, window_bounds = array<i64: 3, 128, 128>}, {pipeline_mode = #tpu.pipeline_mode<synchronous>, transform_indices = @transform_6, window_bounds = array<i64: 128, 208>}, {pipeline_mode = #tpu.pipeline_mode<synchronous>, transform_indices = @transform_7, window_bounds = array<i64: 48, 256>}, {pipeline_mode = #tpu.pipeline_mode<synchronous>, transform_indices = @transform_8, window_bounds = array<i64: 208, 256>}, {pipeline_mode = #tpu.pipeline_mode<synchronous>, transform_indices = @transform_9, window_bounds = array<i64: 1, 1024>}, {transform_indices = @transform_10, window_bounds = array<i64: 1, 16, 256>}]} {
    %cst = arith.constant 0.000000e+00 : f32
    %0 = vector.broadcast %cst : f32 to vector<1x48xf32>
    %cst_0 = arith.constant 0.000000e+00 : f32
    %1 = vector.broadcast %cst_0 : f32 to vector<1x128xf32>
    %c0 = arith.constant 0 : index
    %c0_1 = arith.constant 0 : index
    %2 = vector.load %arg12[%c0, %c0_1] : memref<18x48xf32, #tpu.memory_space<vmem>>, vector<1x48xf32>
    tpu.vector_store %arg12[%c0, %c0_1], %0 {strides = array<i32>} : memref<18x48xf32, #tpu.memory_space<vmem>>, vector<1x48xf32>,
    %c17 = arith.constant 17 : index
    %c0_2 = arith.constant 0 : index
    %3 = vector.load %arg12[%c17, %c0_2] : memref<18x48xf32, #tpu.memory_space<vmem>>, vector<1x48xf32>
    tpu.vector_store %arg12[%c17, %c0_2], %0 {strides = array<i32>} : memref<18x48xf32, #tpu.memory_space<vmem>>, vector<1x48xf32>,
    %c0_3 = arith.constant 0 : index
    %c0_4 = arith.constant 0 : index
    %4 = vector.load %arg13[%c0_3, %c0_4] : memref<18x128xf32, #tpu.memory_space<vmem>>, vector<1x128xf32>
    tpu.vector_store %arg13[%c0_3, %c0_4], %1 {strides = array<i32>} : memref<18x128xf32, #tpu.memory_space<vmem>>, vector<1x128xf32>,
    %c17_5 = arith.constant 17 : index
    %c0_6 = arith.constant 0 : index
    %5 = vector.load %arg13[%c17_5, %c0_6] : memref<18x128xf32, #tpu.memory_space<vmem>>, vector<1x128xf32>
    tpu.vector_store %arg13[%c17_5, %c0_6], %1 {strides = array<i32>} : memref<18x128xf32, #tpu.memory_space<vmem>>, vector<1x128xf32>,
    %c0_7 = arith.constant 0 : index
    %c0_8 = arith.constant 0 : index
    %c0_9 = arith.constant 0 : index
    %6 = vector.load %arg1[%c0_7, %c0_8, %c0_9] : memref<1x16x48xf32, #tpu.memory_space<vmem>>, vector<1x16x48xf32>
    %7 = vector.shape_cast %6 : vector<1x16x48xf32> to vector<16x48xf32>
    %c0_10 = arith.constant 0 : index
    %c0_11 = arith.constant 0 : index
    %c0_12 = arith.constant 0 : index
    %8 = vector.load %arg2[%c0_10, %c0_11, %c0_12] : memref<1x16x128xf32, #tpu.memory_space<vmem>>, vector<1x16x128xf32>
    %9 = vector.shape_cast %8 : vector<1x16x128xf32> to vector<16x128xf32>
    %c1 = arith.constant 1 : index
    %c0_13 = arith.constant 0 : index
    %10 = vector.load %arg12[%c1, %c0_13] : memref<18x48xf32, #tpu.memory_space<vmem>>, vector<16x48xf32>
    tpu.vector_store %arg12[%c1, %c0_13], %7 {strides = array<i32>} : memref<18x48xf32, #tpu.memory_space<vmem>>, vector<16x48xf32>,
    %c0_14 = arith.constant 0 : index
    %c0_15 = arith.constant 0 : index
    %11 = vector.load %arg10[%c0_14, %c0_15] : memref<1x1024xf32, #tpu.memory_space<vmem>>, vector<1x64xf32>
    %c0_16 = arith.constant 0 : index
    %c0_17 = arith.constant 0 : index
    %12 = vector.load %arg12[%c0_16, %c0_17] : memref<18x48xf32, #tpu.memory_space<vmem>>, vector<16x48xf32>
    %13 = arith.truncf %12 : vector<16x48xf32> to vector<16x48xbf16>
    %c0_18 = arith.constant 0 : index
    %c0_19 = arith.constant 0 : index
    %c0_20 = arith.constant 0 : index
    %14 = vector.load %arg3[%c0_18, %c0_19, %c0_20] : memref<3x48x64xbf16, #tpu.memory_space<vmem>>, vector<1x48x64xbf16>
    %15 = vector.shape_cast %14 : vector<1x48x64xbf16> to vector<48x64xbf16>
    %cst_21 = arith.constant dense<0.000000e+00> : vector<16x64xf32>
    %16 = tpu.matmul %13, %15, %cst_21 {dimension_numbers = #tpu.dot_dimension_numbers<[1], [0], [0], [1], [0, 0, 1, 1], [], []>} : vector<16x48xbf16>, vector<48x64xbf16>, vector<16x64xf32> -> vector<16x64xf32>
    %c1_22 = arith.constant 1 : index
    %c0_23 = arith.constant 0 : index
    %17 = vector.load %arg12[%c1_22, %c0_23] : memref<18x48xf32, #tpu.memory_space<vmem>>, vector<16x48xf32>
    %18 = arith.truncf %17 : vector<16x48xf32> to vector<16x48xbf16>
    %c1_24 = arith.constant 1 : index
    %c0_25 = arith.constant 0 : index
    %c0_26 = arith.constant 0 : index
    %19 = vector.load %arg3[%c1_24, %c0_25, %c0_26] : memref<3x48x64xbf16, #tpu.memory_space<vmem>>, vector<1x48x64xbf16>
    %20 = vector.shape_cast %19 : vector<1x48x64xbf16> to vector<48x64xbf16>
    %cst_27 = arith.constant dense<0.000000e+00> : vector<16x64xf32>
    %21 = tpu.matmul %18, %20, %cst_27 {dimension_numbers = #tpu.dot_dimension_numbers<[1], [0], [0], [1], [0, 0, 1, 1], [], []>} : vector<16x48xbf16>, vector<48x64xbf16>, vector<16x64xf32> -> vector<16x64xf32>
    %22 = arith.addf %16, %21 : vector<16x64xf32>
    %c2 = arith.constant 2 : index
    %c0_28 = arith.constant 0 : index
    %23 = vector.load %arg12[%c2, %c0_28] : memref<18x48xf32, #tpu.memory_space<vmem>>, vector<16x48xf32>
    %24 = arith.truncf %23 : vector<16x48xf32> to vector<16x48xbf16>
    %c2_29 = arith.constant 2 : index
    %c0_30 = arith.constant 0 : index
    %c0_31 = arith.constant 0 : index
    %25 = vector.load %arg3[%c2_29, %c0_30, %c0_31] : memref<3x48x64xbf16, #tpu.memory_space<vmem>>, vector<1x48x64xbf16>
    %26 = vector.shape_cast %25 : vector<1x48x64xbf16> to vector<48x64xbf16>
    %cst_32 = arith.constant dense<0.000000e+00> : vector<16x64xf32>
    %27 = tpu.matmul %24, %26, %cst_32 {dimension_numbers = #tpu.dot_dimension_numbers<[1], [0], [0], [1], [0, 0, 1, 1], [], []>} : vector<16x48xbf16>, vector<48x64xbf16>, vector<16x64xf32> -> vector<16x64xf32>
    %28 = arith.addf %22, %27 : vector<16x64xf32>
    %29 = vector.broadcast %11 : vector<1x64xf32> to vector<16x64xf32>
    %30 = arith.addf %28, %29 : vector<16x64xf32>
    %cst_33 = arith.constant 0.000000e+00 : f32
    %31 = vector.broadcast %cst_33 : f32 to vector<16x64xf32>
    %32 = arith.maximumf %30, %31 : vector<16x64xf32>
    %33 = arith.truncf %32 : vector<16x64xf32> to vector<16x64xbf16>
    %c0_34 = arith.constant 0 : index
    %c0_35 = arith.constant 0 : index
    %34 = vector.load %arg4[%c0_34, %c0_35] : memref<64x128xbf16, #tpu.memory_space<vmem>>, vector<64x128xbf16>
    %cst_36 = arith.constant dense<0.000000e+00> : vector<16x128xf32>
    %35 = tpu.matmul %33, %34, %cst_36 {dimension_numbers = #tpu.dot_dimension_numbers<[1], [0], [0], [1], [0, 0, 1, 1], [], []>} : vector<16x64xbf16>, vector<64x128xbf16>, vector<16x128xf32> -> vector<16x128xf32>
    %c0_37 = arith.constant 0 : index
    %c128 = arith.constant 128 : index
    %36 = vector.load %arg10[%c0_37, %c128] : memref<1x1024xf32, #tpu.memory_space<vmem>>, vector<1x128xf32>
    %37 = vector.broadcast %36 : vector<1x128xf32> to vector<16x128xf32>
    %38 = arith.addf %35, %37 : vector<16x128xf32>
    %cst_38 = arith.constant 0.000000e+00 : f32
    %39 = vector.broadcast %cst_38 : f32 to vector<16x128xf32>
    %40 = arith.maximumf %38, %39 : vector<16x128xf32>
    %c1_39 = arith.constant 1 : index
    %c0_40 = arith.constant 0 : index
    %41 = vector.load %arg13[%c1_39, %c0_40] : memref<18x128xf32, #tpu.memory_space<vmem>>, vector<16x128xf32>
    tpu.vector_store %arg13[%c1_39, %c0_40], %40 {strides = array<i32>} : memref<18x128xf32, #tpu.memory_space<vmem>>, vector<16x128xf32>,
    %c0_41 = arith.constant 0 : index
    %c256 = arith.constant 256 : index
    %42 = vector.load %arg10[%c0_41, %c256] : memref<1x1024xf32, #tpu.memory_space<vmem>>, vector<1x128xf32>
    %c0_42 = arith.constant 0 : index
    %c0_43 = arith.constant 0 : index
    %43 = vector.load %arg13[%c0_42, %c0_43] : memref<18x128xf32, #tpu.memory_space<vmem>>, vector<16x128xf32>
    %44 = arith.truncf %43 : vector<16x128xf32> to vector<16x128xbf16>
    %c0_44 = arith.constant 0 : index
    %c0_45 = arith.constant 0 : index
    %c0_46 = arith.constant 0 : index
    %45 = vector.load %arg5[%c0_44, %c0_45, %c0_46] : memref<3x128x128xbf16, #tpu.memory_space<vmem>>, vector<1x128x128xbf16>
    %46 = vector.shape_cast %45 : vector<1x128x128xbf16> to vector<128x128xbf16>
    %cst_47 = arith.constant dense<0.000000e+00> : vector<16x128xf32>
    %47 = tpu.matmul %44, %46, %cst_47 {dimension_numbers = #tpu.dot_dimension_numbers<[1], [0], [0], [1], [0, 0, 1, 1], [], []>} : vector<16x128xbf16>, vector<128x128xbf16>, vector<16x128xf32> -> vector<16x128xf32>
    %c1_48 = arith.constant 1 : index
    %c0_49 = arith.constant 0 : index
    %48 = vector.load %arg13[%c1_48, %c0_49] : memref<18x128xf32, #tpu.memory_space<vmem>>, vector<16x128xf32>
    %49 = arith.truncf %48 : vector<16x128xf32> to vector<16x128xbf16>
    %c1_50 = arith.constant 1 : index
    %c0_51 = arith.constant 0 : index
    %c0_52 = arith.constant 0 : index
    %50 = vector.load %arg5[%c1_50, %c0_51, %c0_52] : memref<3x128x128xbf16, #tpu.memory_space<vmem>>, vector<1x128x128xbf16>
    %51 = vector.shape_cast %50 : vector<1x128x128xbf16> to vector<128x128xbf16>
    %cst_53 = arith.constant dense<0.000000e+00> : vector<16x128xf32>
    %52 = tpu.matmul %49, %51, %cst_53 {dimension_numbers = #tpu.dot_dimension_numbers<[1], [0], [0], [1], [0, 0, 1, 1], [], []>} : vector<16x128xbf16>, vector<128x128xbf16>, vector<16x128xf32> -> vector<16x128xf32>
    %53 = arith.addf %47, %52 : vector<16x128xf32>
    %c2_54 = arith.constant 2 : index
    %c0_55 = arith.constant 0 : index
    %54 = vector.load %arg13[%c2_54, %c0_55] : memref<18x128xf32, #tpu.memory_space<vmem>>, vector<16x128xf32>
    %55 = arith.truncf %54 : vector<16x128xf32> to vector<16x128xbf16>
    %c2_56 = arith.constant 2 : index
    %c0_57 = arith.constant 0 : index
    %c0_58 = arith.constant 0 : index
    %56 = vector.load %arg5[%c2_56, %c0_57, %c0_58] : memref<3x128x128xbf16, #tpu.memory_space<vmem>>, vector<1x128x128xbf16>
    %57 = vector.shape_cast %56 : vector<1x128x128xbf16> to vector<128x128xbf16>
    %cst_59 = arith.constant dense<0.000000e+00> : vector<16x128xf32>
    %58 = tpu.matmul %55, %57, %cst_59 {dimension_numbers = #tpu.dot_dimension_numbers<[1], [0], [0], [1], [0, 0, 1, 1], [], []>} : vector<16x128xbf16>, vector<128x128xbf16>, vector<16x128xf32> -> vector<16x128xf32>
    %59 = arith.addf %53, %58 : vector<16x128xf32>
    %60 = vector.broadcast %42 : vector<1x128xf32> to vector<16x128xf32>
    %61 = arith.addf %59, %60 : vector<16x128xf32>
    %cst_60 = arith.constant 0.000000e+00 : f32
    %62 = vector.broadcast %cst_60 : f32 to vector<16x128xf32>
    %63 = arith.maximumf %61, %62 : vector<16x128xf32>
    %64 = arith.mulf %9, %63 : vector<16x128xf32>
    %c1_61 = arith.constant 1 : index
    %c0_62 = arith.constant 0 : index
    %65 = vector.load %arg13[%c1_61, %c0_62] : memref<18x128xf32, #tpu.memory_space<vmem>>, vector<16x128xf32>
    tpu.vector_store %arg13[%c1_61, %c0_62], %64 {strides = array<i32>} : memref<18x128xf32, #tpu.memory_space<vmem>>, vector<16x128xf32>,
    %c0_63 = arith.constant 0 : index
    %c384 = arith.constant 384 : index
    %66 = vector.load %arg10[%c0_63, %c384] : memref<1x1024xf32, #tpu.memory_space<vmem>>, vector<1x128xf32>
    %c0_64 = arith.constant 0 : index
    %c0_65 = arith.constant 0 : index
    %67 = vector.load %arg13[%c0_64, %c0_65] : memref<18x128xf32, #tpu.memory_space<vmem>>, vector<16x128xf32>
    %68 = arith.truncf %67 : vector<16x128xf32> to vector<16x128xbf16>
    %c0_66 = arith.constant 0 : index
    %c0_67 = arith.constant 0 : index
    %c0_68 = arith.constant 0 : index
    %69 = vector.load %arg6[%c0_66, %c0_67, %c0_68] : memref<3x128x128xbf16, #tpu.memory_space<vmem>>, vector<1x128x128xbf16>
    %70 = vector.shape_cast %69 : vector<1x128x128xbf16> to vector<128x128xbf16>
    %cst_69 = arith.constant dense<0.000000e+00> : vector<16x128xf32>
    %71 = tpu.matmul %68, %70, %cst_69 {dimension_numbers = #tpu.dot_dimension_numbers<[1], [0], [0], [1], [0, 0, 1, 1], [], []>} : vector<16x128xbf16>, vector<128x128xbf16>, vector<16x128xf32> -> vector<16x128xf32>
    %c1_70 = arith.constant 1 : index
    %c0_71 = arith.constant 0 : index
    %72 = vector.load %arg13[%c1_70, %c0_71] : memref<18x128xf32, #tpu.memory_space<vmem>>, vector<16x128xf32>
    %73 = arith.truncf %72 : vector<16x128xf32> to vector<16x128xbf16>
    %c1_72 = arith.constant 1 : index
    %c0_73 = arith.constant 0 : index
    %c0_74 = arith.constant 0 : index
    %74 = vector.load %arg6[%c1_72, %c0_73, %c0_74] : memref<3x128x128xbf16, #tpu.memory_space<vmem>>, vector<1x128x128xbf16>
    %75 = vector.shape_cast %74 : vector<1x128x128xbf16> to vector<128x128xbf16>
    %cst_75 = arith.constant dense<0.000000e+00> : vector<16x128xf32>
    %76 = tpu.matmul %73, %75, %cst_75 {dimension_numbers = #tpu.dot_dimension_numbers<[1], [0], [0], [1], [0, 0, 1, 1], [], []>} : vector<16x128xbf16>, vector<128x128xbf16>, vector<16x128xf32> -> vector<16x128xf32>
    %77 = arith.addf %71, %76 : vector<16x128xf32>
    %c2_76 = arith.constant 2 : index
    %c0_77 = arith.constant 0 : index
    %78 = vector.load %arg13[%c2_76, %c0_77] : memref<18x128xf32, #tpu.memory_space<vmem>>, vector<16x128xf32>
    %79 = arith.truncf %78 : vector<16x128xf32> to vector<16x128xbf16>
    %c2_78 = arith.constant 2 : index
    %c0_79 = arith.constant 0 : index
    %c0_80 = arith.constant 0 : index
    %80 = vector.load %arg6[%c2_78, %c0_79, %c0_80] : memref<3x128x128xbf16, #tpu.memory_space<vmem>>, vector<1x128x128xbf16>
    %81 = vector.shape_cast %80 : vector<1x128x128xbf16> to vector<128x128xbf16>
    %cst_81 = arith.constant dense<0.000000e+00> : vector<16x128xf32>
    %82 = tpu.matmul %79, %81, %cst_81 {dimension_numbers = #tpu.dot_dimension_numbers<[1], [0], [0], [1], [0, 0, 1, 1], [], []>} : vector<16x128xbf16>, vector<128x128xbf16>, vector<16x128xf32> -> vector<16x128xf32>
    %83 = arith.addf %77, %82 : vector<16x128xf32>
    %84 = vector.broadcast %66 : vector<1x128xf32> to vector<16x128xf32>
    %85 = arith.addf %83, %84 : vector<16x128xf32>
    %86 = arith.addf %9, %85 : vector<16x128xf32>
    %87 = arith.truncf %86 : vector<16x128xf32> to vector<16x128xbf16>
    %c0_82 = arith.constant 0 : index
    %c0_83 = arith.constant 0 : index
    %88 = vector.load %arg7[%c0_82, %c0_83] : memref<128x208xbf16, #tpu.memory_space<vmem>>, vector<128x208xbf16>
    %cst_84 = arith.constant dense<0.000000e+00> : vector<16x208xf32>
    %89 = tpu.matmul %87, %88, %cst_84 {dimension_numbers = #tpu.dot_dimension_numbers<[1], [0], [0], [1], [0, 0, 1, 1], [], []>} : vector<16x128xbf16>, vector<128x208xbf16>, vector<16x208xf32> -> vector<16x208xf32>
    %c0_85 = arith.constant 0 : index
    %c512 = arith.constant 512 : index
    %90 = vector.load %arg10[%c0_85, %c512] : memref<1x1024xf32, #tpu.memory_space<vmem>>, vector<1x208xf32>
    %91 = vector.broadcast %90 : vector<1x208xf32> to vector<16x208xf32>
    %92 = arith.addf %89, %91 : vector<16x208xf32>
    %cst_86 = arith.constant 0.000000e+00 : f32
    %93 = vector.broadcast %cst_86 : f32 to vector<16x208xf32>
    %94 = arith.maximumf %92, %93 : vector<16x208xf32>
    %95 = arith.truncf %7 : vector<16x48xf32> to vector<16x48xbf16>
    %c0_87 = arith.constant 0 : index
    %c0_88 = arith.constant 0 : index
    %96 = vector.load %arg8[%c0_87, %c0_88] : memref<48x256xbf16, #tpu.memory_space<vmem>>, vector<48x256xbf16>
    %cst_89 = arith.constant dense<0.000000e+00> : vector<16x256xf32>
    %97 = tpu.matmul %95, %96, %cst_89 {dimension_numbers = #tpu.dot_dimension_numbers<[1], [0], [0], [1], [0, 0, 1, 1], [], []>} : vector<16x48xbf16>, vector<48x256xbf16>, vector<16x256xf32> -> vector<16x256xf32>
    %98 = arith.truncf %94 : vector<16x208xf32> to vector<16x208xbf16>
    %c0_90 = arith.constant 0 : index
    %c0_91 = arith.constant 0 : index
    %99 = vector.load %arg9[%c0_90, %c0_91] : memref<208x256xbf16, #tpu.memory_space<vmem>>, vector<208x256xbf16>
    %cst_92 = arith.constant dense<0.000000e+00> : vector<16x256xf32>
    %100 = tpu.matmul %98, %99, %cst_92 {dimension_numbers = #tpu.dot_dimension_numbers<[1], [0], [0], [1], [0, 0, 1, 1], [], []>} : vector<16x208xbf16>, vector<208x256xbf16>, vector<16x256xf32> -> vector<16x256xf32>
    %101 = arith.addf %97, %100 : vector<16x256xf32>
    %c0_93 = arith.constant 0 : index
    %c768 = arith.constant 768 : index
    %102 = vector.load %arg10[%c0_93, %c768] : memref<1x1024xf32, #tpu.memory_space<vmem>>, vector<1x256xf32>
    %103 = vector.broadcast %102 : vector<1x256xf32> to vector<16x256xf32>
    %104 = arith.addf %101, %103 : vector<16x256xf32>
    %c0_94 = arith.constant 0 : index
    %c0_95 = arith.constant 0 : index
    %c0_96 = arith.constant 0 : index
    %105 = vector.load %arg11[%c0_94, %c0_95, %c0_96] : memref<1x16x256xf32, #tpu.memory_space<vmem>>, vector<1x16x256xf32>
    %106 = vector.shape_cast %105 : vector<1x16x256xf32> to vector<16x256xf32>
    %107 = vector.shape_cast %104 : vector<16x256xf32> to vector<1x16x256xf32>
    tpu.vector_store %arg11[%c0_94, %c0_95, %c0_96], %107 {strides = array<i32>} : memref<1x16x256xf32, #tpu.memory_space<vmem>>, vector<1x16x256xf32>,
    return
  }
  func.func @transform_0(%arg0: i32) -> (i32, i32, i32) {
    %c0_i32 = arith.constant 0 : i32
    %c0_i32_0 = arith.constant 0 : i32
    %c0_i32_1 = arith.constant 0 : i32
    return %arg0, %c0_i32, %c0_i32_0 : i32, i32, i32
  }
  func.func @transform_1(%arg0: i32) -> (i32, i32, i32) {
    %c0_i32 = arith.constant 0 : i32
    %c0_i32_0 = arith.constant 0 : i32
    %c0_i32_1 = arith.constant 0 : i32
    return %arg0, %c0_i32, %c0_i32_0 : i32, i32, i32
  }
  func.func @transform_2(%arg0: i32) -> (i32, i32, i32) {
    %c0_i32 = arith.constant 0 : i32
    %c0_i32_0 = arith.constant 0 : i32
    %c0_i32_1 = arith.constant 0 : i32
    %c0_i32_2 = arith.constant 0 : i32
    return %c0_i32, %c0_i32_0, %c0_i32_1 : i32, i32, i32
  }
  func.func @transform_3(%arg0: i32) -> (i32, i32) {
    %c0_i32 = arith.constant 0 : i32
    %c0_i32_0 = arith.constant 0 : i32
    %c0_i32_1 = arith.constant 0 : i32
    return %c0_i32, %c0_i32_0 : i32, i32
  }
  func.func @transform_4(%arg0: i32) -> (i32, i32, i32) {
    %c0_i32 = arith.constant 0 : i32
    %c0_i32_0 = arith.constant 0 : i32
    %c0_i32_1 = arith.constant 0 : i32
    %c0_i32_2 = arith.constant 0 : i32
    return %c0_i32, %c0_i32_0, %c0_i32_1 : i32, i32, i32
  }
  func.func @transform_5(%arg0: i32) -> (i32, i32, i32) {
    %c0_i32 = arith.constant 0 : i32
    %c0_i32_0 = arith.constant 0 : i32
    %c0_i32_1 = arith.constant 0 : i32
    %c0_i32_2 = arith.constant 0 : i32
    return %c0_i32, %c0_i32_0, %c0_i32_1 : i32, i32, i32
  }
  func.func @transform_6(%arg0: i32) -> (i32, i32) {
    %c0_i32 = arith.constant 0 : i32
    %c0_i32_0 = arith.constant 0 : i32
    %c0_i32_1 = arith.constant 0 : i32
    return %c0_i32, %c0_i32_0 : i32, i32
  }
  func.func @transform_7(%arg0: i32) -> (i32, i32) {
    %c0_i32 = arith.constant 0 : i32
    %c0_i32_0 = arith.constant 0 : i32
    %c0_i32_1 = arith.constant 0 : i32
    return %c0_i32, %c0_i32_0 : i32, i32
  }
  func.func @transform_8(%arg0: i32) -> (i32, i32) {
    %c0_i32 = arith.constant 0 : i32
    %c0_i32_0 = arith.constant 0 : i32
    %c0_i32_1 = arith.constant 0 : i32
    return %c0_i32, %c0_i32_0 : i32, i32
  }
  func.func @transform_9(%arg0: i32) -> (i32, i32) {
    %c0_i32 = arith.constant 0 : i32
    %c0_i32_0 = arith.constant 0 : i32
    %c0_i32_1 = arith.constant 0 : i32
    return %c0_i32, %c0_i32_0 : i32, i32
  }
  func.func @transform_10(%arg0: i32) -> (i32, i32, i32) {
    %c0_i32 = arith.constant 0 : i32
    %c0_i32_0 = arith.constant 0 : i32
    %c0_i32_1 = arith.constant 0 : i32
    return %arg0, %c0_i32, %c0_i32_0 : i32, i32, i32
  }
}

</mosaic_0001>

<bundles_post_ra>
// kernel: tile.26
= control target key start
LH: loop header
LB: loop body
LE: loop exit
PB: predicated region body
PF: predicated region fallthrough
CT: control target
= control target key end

     0   :  { %s28_s0 = inlined_call_operand.vmem [shape: f32[4], index: 0, kind: input, shape index: {}]   ;;  %s29_s1 = inlined_call_operand.vmem [shape: f32[16,4], index: 1, kind: output, shape index: {}]  }
   0x1   :  { %v4_v0 = vld [vmem:[%s28_s0] ss:$0 sm:$0xff] }
   0x2   :  { %5 = vst [vmem:[%s29_s1] sm:$0xff] %v4_v0  ;;  %8 = vst [vmem:[%s29_s1 + $0x8] sm:$0xff] %v4_v0 }

// kernel: tile.27
= control target key start
LH: loop header
LB: loop body
LE: loop exit
PB: predicated region body
PF: predicated region fallthrough
CT: control target
= control target key end

     0   :  { %s131_s10 = smov 60   ;;  %s132_s11 = smov 52   ;;  %vm3_vm0 = vcmask 31744   ;;  %vm9_vm1 = vcmask 523744   ;;  %vm15_vm2 = vcmask 490944   ;;  %vm21_vm3 = vcmask 458144   ;;  %s207_s0 = inlined_call_operand.vmem [shape: f32[16,4], index: 0, kind: input, shape index: {}]   ;;  %s208_s1 = inlined_call_operand.vmem [shape: f32[64], index: 1, kind: output, shape index: {}]  }
   0x1   :  { %v101_v0 = vld [vmem:[%s207_s0 + $0xf] sm:$0x1]   ;;  %v103_v1 = vld [vmem:[%s207_s0 + $0xd] sm:$0x1]   ;;  %v102_v2 = vld [vmem:[%s207_s0 + $0xe] sm:$0x1]  }
   0x2   :  { %7 = vrot.lane.b32.xlu0 %v101_v0, %s131_s10  ;;  %19 = vrot.lane.b32.xlu1 %v103_v1, %s132_s11  ;;  %v104_v3 = vld [vmem:[%s207_s0 + $0xc] sm:$0x1]   ;;  %s133_s16 = smov 56   ;;  %s134_s17 = smov 48   ;;  %v105_v4 = vld [vmem:[%s207_s0 + $0xb] sm:$0x1]  }
   0x3   :  { %v106_v5 = vld [vmem:[%s207_s0 + $0xa] sm:$0x1]   ;;  %v2_v6 = vld [vmem:[%s207_s0] sm:$0x1]   ;;  %s135_s24 = smov 44   ;;  %s136_s25 = smov 40  }
   0x4   :  { %4 = vst.msk [vmem:[#allocation0] sm:$0x1] %vm3_vm0, %v2_v6   ;;  %v107_v7 = vld [vmem:[%s207_s0 + $0x9] sm:$0x1]   ;;  %v108_v8 = vld [vmem:[%s207_s0 + $0x8] sm:$0x1]  }
   0x5   :  { %s137_s30 = smov 36   ;;  %s138_s2 = smov 32   ;;  %v109_v9 = vld [vmem:[%s207_s0 + $0x7] sm:$0x1]   ;;  %v110_v10 = vld [vmem:[%s207_s0 + $0x6] sm:$0x1]  }
   0x6   :  { %13 = vrot.lane.b32.xlu0 %v102_v2, %s133_s16  ;;  %25 = vrot.lane.b32.xlu1 %v104_v3, %s134_s17  ;;  %s139_s7 = smov 28   ;;  %s140_s8 = smov 24   ;;  %v111_v11 = vld [vmem:[%s207_s0 + $0x5] sm:$0x1]   ;;  %v112_v12 = vld [vmem:[%s207_s0 + $0x4] sm:$0x1]  }
   0x7   :  { %s141_s13 = smov 20   ;;  %s142_s14 = smov 16   ;;  %v113_v13 = vld [vmem:[%s207_s0 + $0x3] sm:$0x1]   ;;  %v114_v14 = vld [vmem:[%s207_s0 + $0x2] sm:$0x1]  }
   0x8   :  { %s143_s19 = smov 12   ;;  %s144_s20 = smov 8   ;;  %v115_v15 = vld [vmem:[%s207_s0 + $0x1] sm:$0x1]   ;;  %vm27_vm4 = vcmask 425344   ;;  %vm33_vm5 = vcmask 392544  }
   0x9   :  { %s145_s0 = smov 4   ;;  %vm39_vm6 = vcmask 359744   ;;  %vm45_vm7 = vcmask 326944   ;;  %vm51_vm8 = vcmask 294144   ;;  %vm57_vm9 = vcmask 261344  }
   0xa   :  { %31 = vrot.lane.b32.xlu0 %v105_v4, %s135_s24  ;;  %37 = vrot.lane.b32.xlu1 %v106_v5, %s136_s25  ;;  %vm63_vm10 = vcmask 228544   ;;  %vm69_vm11 = vcmask 195744   ;;  %vm75_vm12 = vcmask 162944   ;;  %vm81_vm13 = vcmask 130144  }
   0xb   :  { %vm87_vm14 = vcmask 97344   ;;  %vm93_vm15 = vcmask 64544  }
   0xe   :  { %43 = vrot.lane.b32.xlu0 %v107_v7, %s137_s30  ;;  %49 = vrot.lane.b32.xlu1 %v108_v8, %s138_s2 }
  0x12   :  { %55 = vrot.lane.b32.xlu0 %v109_v9, %s139_s7  ;;  %61 = vrot.lane.b32.xlu1 %v110_v10, %s140_s8 }
  0x16   :  { %67 = vrot.lane.b32.xlu0 %v111_v11, %s141_s13  ;;  %73 = vrot.lane.b32.xlu1 %v112_v12, %s142_s14 }
  0x1a   :  { %79 = vrot.lane.b32.xlu0 %v113_v13, %s143_s19  ;;  %85 = vrot.lane.b32.xlu1 %v114_v14, %s144_s20 }
  0x1e   :  { %91 = vrot.lane.b32.xlu0 %v115_v15, %s145_s0 }
  0x74   :  { %v8_v16 = vpop.permute.xlu0 %7   ;;  %v20_v17 = vpop.permute.xlu1 %19  }
  0x75   :  { %10 = vst.msk [vmem:[#allocation0] sm:$0x1] %vm9_vm1, %v8_v16  }
  0x78   :  { %v14_v18 = vpop.permute.xlu0 %13   ;;  %v26_v19 = vpop.permute.xlu1 %25  }
  0x79   :  { %16 = vst.msk [vmem:[#allocation0] sm:$0x1] %vm15_vm2, %v14_v18  }
  0x7a   :  { %22 = vst.msk [vmem:[#allocation0] sm:$0x1] %vm21_vm3, %v20_v17  }
  0x7b   :  { %28 = vst.msk [vmem:[#allocation0] sm:$0x1] %vm27_vm4, %v26_v19  }
  0x7c   :  { %v32_v20 = vpop.permute.xlu0 %31   ;;  %v38_v21 = vpop.permute.xlu1 %37  }
  0x7d   :  { %34 = vst.msk [vmem:[#allocation0] sm:$0x1] %vm33_vm5, %v32_v20  }
  0x7e   :  { %40 = vst.msk [vmem:[#allocation0] sm:$0x1] %vm39_vm6, %v38_v21  }
  0x80   :  { %v44_v22 = vpop.permute.xlu0 %43   ;;  %v50_v23 = vpop.permute.xlu1 %49  }
  0x81   :  { %46 = vst.msk [vmem:[#allocation0] sm:$0x1] %vm45_vm7, %v44_v22  }
  0x82   :  { %52 = vst.msk [vmem:[#allocation0] sm:$0x1] %vm51_vm8, %v50_v23  }
  0x84   :  { %v56_v24 = vpop.permute.xlu0 %55   ;;  %v62_v25 = vpop.permute.xlu1 %61  }
  0x85   :  { %58 = vst.msk [vmem:[#allocation0] sm:$0x1] %vm57_vm9, %v56_v24  }
  0x86   :  { %64 = vst.msk [vmem:[#allocation0] sm:$0x1] %vm63_vm10, %v62_v25  }
  0x88   :  { %v68_v26 = vpop.permute.xlu0 %67   ;;  %v74_v27 = vpop.permute.xlu1 %73  }
  0x89   :  { %70 = vst.msk [vmem:[#allocation0] sm:$0x1] %vm69_vm11, %v68_v26  }
  0x8a   :  { %76 = vst.msk [vmem:[#allocation0] sm:$0x1] %vm75_vm12, %v74_v27  }
  0x8c   :  { %v80_v28 = vpop.permute.xlu0 %79   ;;  %v86_v29 = vpop.permute.xlu1 %85  }
  0x8d   :  { %82 = vst.msk [vmem:[#allocation0] sm:$0x1] %vm81_vm13, %v80_v28  }
  0x8e   :  { %88 = vst.msk [vmem:[#allocation0] sm:$0x1] %vm87_vm14, %v86_v29  }
  0x90   :  { %v92_v30 = vpop.permute.xlu0 %91  }
  0x91   :  { %94 = vst.msk [vmem:[#allocation0] sm:$0x1] %vm93_vm15, %v92_v30  }
  0x98   :  { %v98_v31 = vld [vmem:[#allocation0] sm:$0x1] }
  0x99   :  { %100 = vst [vmem:[%s208_s1] sm:$0x1] %v98_v31 }

// kernel: custom-call
= control target key start
LH: loop header
LB: loop body
LE: loop exit
PB: predicated region body
PF: predicated region fallthrough
CT: control target
= control target key end

     0   :  { %s6_s0 = inlined_call_operand.vmem [shape: f32[1024], index: 0, kind: output, shape index: {}]  }

// kernel: tile.30
= control target key start
LH: loop header
LB: loop body
LE: loop exit
PB: predicated region body
PF: predicated region fallthrough
CT: control target
= control target key end

     0   :  { %s28_s0 = inlined_call_operand.vmem [shape: f32[8], index: 0, kind: input, shape index: {}]   ;;  %s29_s1 = inlined_call_operand.vmem [shape: f32[16,8], index: 1, kind: output, shape index: {}]  }
   0x1   :  { %v4_v0 = vld [vmem:[%s28_s0] ss:$0 sm:$0xff] }
   0x2   :  { %5 = vst [vmem:[%s29_s1] sm:$0xff] %v4_v0  ;;  %8 = vst [vmem:[%s29_s1 + $0x8] sm:$0xff] %v4_v0 }

// kernel: tile.31
= control target key start
LH: loop header
LB: loop body
LE: loop exit
PB: predicated region body
PF: predicated region fallthrough
CT: control target
= control target key end

     0   :  { %s131_s10 = smov 120   ;;  %s132_s11 = smov 104   ;;  %vm3_vm0 = vcmask 64512   ;;  %vm9_vm1 = vcmask 1048512   ;;  %vm15_vm2 = vcmask 982912   ;;  %vm21_vm3 = vcmask 917312   ;;  %s207_s0 = inlined_call_operand.vmem [shape: f32[16,8], index: 0, kind: input, shape index: {}]   ;;  %s208_s1 = inlined_call_operand.vmem [shape: f32[128], index: 1, kind: output, shape index: {}]  }
   0x1   :  { %v101_v0 = vld [vmem:[%s207_s0 + $0xf] sm:$0x1]   ;;  %v103_v1 = vld [vmem:[%s207_s0 + $0xd] sm:$0x1]   ;;  %v102_v2 = vld [vmem:[%s207_s0 + $0xe] sm:$0x1]  }
   0x2   :  { %7 = vrot.lane.b32.xlu0 %v101_v0, %s131_s10  ;;  %19 = vrot.lane.b32.xlu1 %v103_v1, %s132_s11  ;;  %v104_v3 = vld [vmem:[%s207_s0 + $0xc] sm:$0x1]   ;;  %s133_s16 = smov 112   ;;  %s134_s17 = smov 96   ;;  %v105_v4 = vld [vmem:[%s207_s0 + $0xb] sm:$0x1]  }
   0x3   :  { %v106_v5 = vld [vmem:[%s207_s0 + $0xa] sm:$0x1]   ;;  %v2_v6 = vld [vmem:[%s207_s0] sm:$0x1]   ;;  %s135_s24 = smov 88   ;;  %s136_s25 = smov 80  }
   0x4   :  { %4 = vst.msk [vmem:[#allocation0] sm:$0x1] %vm3_vm0, %v2_v6   ;;  %v107_v7 = vld [vmem:[%s207_s0 + $0x9] sm:$0x1]   ;;  %v108_v8 = vld [vmem:[%s207_s0 + $0x8] sm:$0x1]  }
   0x5   :  { %s137_s30 = smov 72   ;;  %s138_s2 = smov 64   ;;  %v109_v9 = vld [vmem:[%s207_s0 + $0x7] sm:$0x1]   ;;  %v110_v10 = vld [vmem:[%s207_s0 + $0x6] sm:$0x1]  }
   0x6   :  { %13 = vrot.lane.b32.xlu0 %v102_v2, %s133_s16  ;;  %25 = vrot.lane.b32.xlu1 %v104_v3, %s134_s17  ;;  %s139_s7 = smov 56   ;;  %s140_s8 = smov 48   ;;  %v111_v11 = vld [vmem:[%s207_s0 + $0x5] sm:$0x1]   ;;  %v112_v12 = vld [vmem:[%s207_s0 + $0x4] sm:$0x1]  }
   0x7   :  { %s141_s13 = smov 40   ;;  %s142_s14 = smov 32   ;;  %v113_v13 = vld [vmem:[%s207_s0 + $0x3] sm:$0x1]   ;;  %v114_v14 = vld [vmem:[%s207_s0 + $0x2] sm:$0x1]  }
   0x8   :  { %s143_s19 = smov 24   ;;  %s144_s20 = smov 16   ;;  %v115_v15 = vld [vmem:[%s207_s0 + $0x1] sm:$0x1]   ;;  %vm27_vm4 = vcmask 851712   ;;  %vm33_vm5 = vcmask 786112  }
   0x9   :  { %s145_s0 = smov 8   ;;  %vm39_vm6 = vcmask 720512   ;;  %vm45_vm7 = vcmask 654912   ;;  %vm51_vm8 = vcmask 589312   ;;  %vm57_vm9 = vcmask 523712  }
   0xa   :  { %31 = vrot.lane.b32.xlu0 %v105_v4, %s135_s24  ;;  %37 = vrot.lane.b32.xlu1 %v106_v5, %s136_s25  ;;  %vm63_vm10 = vcmask 458112   ;;  %vm69_vm11 = vcmask 392512   ;;  %vm75_vm12 = vcmask 326912   ;;  %vm81_vm13 = vcmask 261312  }
   0xb   :  { %vm87_vm14 = vcmask 195712   ;;  %vm93_vm15 = vcmask 130112  }
   0xe   :  { %43 = vrot.lane.b32.xlu0 %v107_v7, %s137_s30  ;;  %49 = vrot.lane.b32.xlu1 %v108_v8, %s138_s2 }
  0x12   :  { %55 = vrot.lane.b32.xlu0 %v109_v9, %s139_s7  ;;  %61 = vrot.lane.b32.xlu1 %v110_v10, %s140_s8 }
  0x16   :  { %67 = vrot.lane.b32.xlu0 %v111_v11, %s141_s13  ;;  %73 = vrot.lane.b32.xlu1 %v112_v12, %s142_s14 }
  0x1a   :  { %79 = vrot.lane.b32.xlu0 %v113_v13, %s143_s19  ;;  %85 = vrot.lane.b32.xlu1 %v114_v14, %s144_s20 }
  0x1e   :  { %91 = vrot.lane.b32.xlu0 %v115_v15, %s145_s0 }
  0x74   :  { %v8_v16 = vpop.permute.xlu0 %7   ;;  %v20_v17 = vpop.permute.xlu1 %19  }
  0x75   :  { %10 = vst.msk [vmem:[#allocation0] sm:$0x1] %vm9_vm1, %v8_v16  }
  0x78   :  { %v14_v18 = vpop.permute.xlu0 %13   ;;  %v26_v19 = vpop.permute.xlu1 %25  }
  0x79   :  { %16 = vst.msk [vmem:[#allocation0] sm:$0x1] %vm15_vm2, %v14_v18  }
  0x7a   :  { %22 = vst.msk [vmem:[#allocation0] sm:$0x1] %vm21_vm3, %v20_v17  }
  0x7b   :  { %28 = vst.msk [vmem:[#allocation0] sm:$0x1] %vm27_vm4, %v26_v19  }
  0x7c   :  { %v32_v20 = vpop.permute.xlu0 %31   ;;  %v38_v21 = vpop.permute.xlu1 %37  }
  0x7d   :  { %34 = vst.msk [vmem:[#allocation0] sm:$0x1] %vm33_vm5, %v32_v20  }
  0x7e   :  { %40 = vst.msk [vmem:[#allocation0] sm:$0x1] %vm39_vm6, %v38_v21  }
  0x80   :  { %v44_v22 = vpop.permute.xlu0 %43   ;;  %v50_v23 = vpop.permute.xlu1 %49  }
  0x81   :  { %46 = vst.msk [vmem:[#allocation0] sm:$0x1] %vm45_vm7, %v44_v22  }
  0x82   :  { %52 = vst.msk [vmem:[#allocation0] sm:$0x1] %vm51_vm8, %v50_v23  }
  0x84   :  { %v56_v24 = vpop.permute.xlu0 %55   ;;  %v62_v25 = vpop.permute.xlu1 %61  }
  0x85   :  { %58 = vst.msk [vmem:[#allocation0] sm:$0x1] %vm57_vm9, %v56_v24  }
  0x86   :  { %64 = vst.msk [vmem:[#allocation0] sm:$0x1] %vm63_vm10, %v62_v25  }
  0x88   :  { %v68_v26 = vpop.permute.xlu0 %67   ;;  %v74_v27 = vpop.permute.xlu1 %73  }
  0x89   :  { %70 = vst.msk [vmem:[#allocation0] sm:$0x1] %vm69_vm11, %v68_v26  }
  0x8a   :  { %76 = vst.msk [vmem:[#allocation0] sm:$0x1] %vm75_vm12, %v74_v27  }
  0x8c   :  { %v80_v28 = vpop.permute.xlu0 %79   ;;  %v86_v29 = vpop.permute.xlu1 %85  }
  0x8d   :  { %82 = vst.msk [vmem:[#allocation0] sm:$0x1] %vm81_vm13, %v80_v28  }
  0x8e   :  { %88 = vst.msk [vmem:[#allocation0] sm:$0x1] %vm87_vm14, %v86_v29  }
  0x90   :  { %v92_v30 = vpop.permute.xlu0 %91  }
  0x91   :  { %94 = vst.msk [vmem:[#allocation0] sm:$0x1] %vm93_vm15, %v92_v30  }
  0x98   :  { %v98_v31 = vld [vmem:[#allocation0] sm:$0x1] }
  0x99   :  { %100 = vst [vmem:[%s208_s1] sm:$0x1] %v98_v31 }

// kernel: tile.42
= control target key start
LH: loop header
LB: loop body
LE: loop exit
PB: predicated region body
PF: predicated region fallthrough
CT: control target
= control target key end

     0   :  { %s28_s0 = inlined_call_operand.vmem [shape: f32[13], index: 0, kind: input, shape index: {}]   ;;  %s29_s1 = inlined_call_operand.vmem [shape: f32[16,13], index: 1, kind: output, shape index: {}]  }
   0x1   :  { %v4_v0 = vld [vmem:[%s28_s0] ss:$0 sm:$0xff] }
   0x2   :  { %5 = vst [vmem:[%s29_s1] sm:$0xff] %v4_v0  ;;  %8 = vst [vmem:[%s29_s1 + $0x8] sm:$0xff] %v4_v0 }

// kernel: tile.43
= control target key start
LH: loop header
LB: loop body
LE: loop exit
PB: predicated region body
PF: predicated region fallthrough
CT: control target
= control target key end

     0   :  { %vm9_vm0 = vcmask 89088   ;;  %s145_s12 = smov 117   ;;  %s146_s13 = smov 91   ;;  %vm3_vm1 = vcmask 105472   ;;  %vm13_vm2 = vcmask 15360   ;;  %vm16_vm3 = vcmask 1048488   ;;  %s224_s0 = inlined_call_operand.vmem [shape: f32[16,13], index: 0, kind: input, shape index: {}]   ;;  %s225_s1 = inlined_call_operand.vmem [shape: f32[208], index: 1, kind: output, shape index: {}]  }
   0x1   :  { %v114_v0 = vld [vmem:[%s224_s0 + $0x9] sm:$0x1]   ;;  %v117_v3 = vld [vmem:[%s224_s0 + $0x7] sm:$0x1]   ;;  %v116_v4 = vld [vmem:[%s224_s0 + $0x8] sm:$0x1]  }
   0x2   :  { %v115_v1 = vld [vmem:[%s224_s0 + $0x9] sm:$0x1]   ;;  %26 = vrot.lane.b32.xlu1 %v117_v3, %s146_s13  ;;  %v118_v5 = vld [vmem:[%s224_s0 + $0x6] sm:$0x1]   ;;  %s147_s18 = smov 104   ;;  %s148_s19 = smov 78  }
   0x3   :  { %v10_v2 = vsel %vm9_vm0, %v115_v1, %v114_v0  ;;  %v119_v6 = vld [vmem:[%s224_s0 + $0xf] sm:$0x1]   ;;  %v120_v7 = vld [vmem:[%s224_s0 + $0x5] sm:$0x1]   ;;  %v2_v8 = vld [vmem:[%s224_s0] sm:$0x1]  }
   0x4   :  { %11 = vrot.lane.b32.xlu0 %v10_v2, %s145_s12  ;;  %4 = vst.msk [vmem:[#allocation0] sm:$0x1] %vm3_vm1, %v2_v8   ;;  %s149_s26 = smov 67   ;;  %s150_s27 = smov 65   ;;  %v121_v9 = vld [vmem:[%s224_s0 + $0xe] sm:$0x1]  }
   0x5   :  { %v122_v10 = vld [vmem:[%s224_s0 + $0x4] sm:$0x1]   ;;  %s151_s3 = smov 54   ;;  %s152_s4 = smov 52   ;;  %v123_v11 = vld [vmem:[%s224_s0 + $0xd] sm:$0x1]  }
   0x6   :  { %32 = vrot.lane.b32.xlu1 %v118_v5, %s148_s19  ;;  %v124_v12 = vld [vmem:[%s224_s0 + $0x3] sm:$0x1]   ;;  %s153_s9 = smov 41   ;;  %s154_s10 = smov 39   ;;  %v125_v13 = vld [vmem:[%s224_s0 + $0xc] sm:$0x1]  }
   0x7   :  { %v126_v14 = vld [vmem:[%s224_s0 + $0x2] sm:$0x1]   ;;  %s155_s15 = smov 28   ;;  %s156_s16 = smov 26   ;;  %v127_v15 = vld [vmem:[%s224_s0 + $0xb] sm:$0x1]  }
   0x8   :  { %20 = vrot.lane.b32.xlu0 %v116_v4, %s147_s18  ;;  %v128_v16 = vld [vmem:[%s224_s0 + $0x1] sm:$0x1]   ;;  %s157_s21 = smov 15   ;;  %s158_s22 = smov 13   ;;  %v129_v17 = vld [vmem:[%s224_s0 + $0xa] sm:$0x1]  }
   0x9   :  { %s159_s0 = smov 2   ;;  %vm22_vm4 = vcmask 958272   ;;  %vm28_vm5 = vcmask 851672   ;;  %vm34_vm6 = vcmask 745072   ;;  %vm40_vm7 = vcmask 654872  }
   0xa   :  { %45 = vrot.lane.b32.xlu1 %v120_v7, %s150_s27  ;;  %vm47_vm8 = vcmask 638472   ;;  %vm53_vm9 = vcmask 548272   ;;  %vm60_vm10 = vcmask 531872   ;;  %vm66_vm11 = vcmask 441672  }
   0xb   :  { %vm73_vm12 = vcmask 425272   ;;  %vm79_vm13 = vcmask 335072   ;;  %vm86_vm14 = vcmask 318672   ;;  %vm92_vm15 = vcmask 228472  }
   0xc   :  { %38 = vrot.lane.b32.xlu0 %v119_v6, %s149_s26  ;;  %vm99_vm0 = vcmask 212072   ;;  %vm105_vm1 = vcmask 121872  }
   0xe   :  { %58 = vrot.lane.b32.xlu1 %v122_v10, %s152_s4 }
  0x10   :  { %51 = vrot.lane.b32.xlu0 %v121_v9, %s151_s3 }
  0x12   :  { %71 = vrot.lane.b32.xlu1 %v124_v12, %s154_s10 }
  0x14   :  { %64 = vrot.lane.b32.xlu0 %v123_v11, %s153_s9 }
  0x16   :  { %84 = vrot.lane.b32.xlu1 %v126_v14, %s156_s16 }
  0x18   :  { %77 = vrot.lane.b32.xlu0 %v125_v13, %s155_s15 }
  0x1a   :  { %97 = vrot.lane.b32.xlu1 %v128_v16, %s158_s22 }
  0x1c   :  { %90 = vrot.lane.b32.xlu0 %v127_v15, %s157_s21 }
  0x20   :  { %103 = vrot.lane.b32.xlu0 %v129_v17, %s159_s0 }
  0x74   :  { %v27_v19 = vpop.permute.xlu1 %26  }
  0x76   :  { %v12_v18 = vpop.permute.xlu0 %11  }
  0x77   :  { %15 = vst.msk [vmem:[#allocation0 + $0x1] sm:$0x1] %vm13_vm2, %v12_v18  }
  0x78   :  { %17 = vst.msk [vmem:[#allocation0] sm:$0x1] %vm16_vm3, %v12_v18   ;;  %v33_v21 = vpop.permute.xlu1 %32  }
  0x7a   :  { %v21_v20 = vpop.permute.xlu0 %20  }
  0x7b   :  { %23 = vst.msk [vmem:[#allocation0] sm:$0x1] %vm22_vm4, %v21_v20  }
  0x7c   :  { %29 = vst.msk [vmem:[#allocation0] sm:$0x1] %vm28_vm5, %v27_v19   ;;  %v46_v23 = vpop.permute.xlu1 %45  }
  0x7d   :  { %35 = vst.msk [vmem:[#allocation0] sm:$0x1] %vm34_vm6, %v33_v21  }
  0x7e   :  { %v39_v22 = vpop.permute.xlu0 %38   ;;  %48 = vst.msk [vmem:[#allocation0] sm:$0x1] %vm47_vm8, %v46_v23  }
  0x7f   :  { %42 = vst.msk [vmem:[#allocation0 + $0x1] sm:$0x1] %vm40_vm7, %v39_v22  }
  0x80   :  { %v59_v25 = vpop.permute.xlu1 %58  }
  0x81   :  { %61 = vst.msk [vmem:[#allocation0] sm:$0x1] %vm60_vm10, %v59_v25  }
  0x82   :  { %v52_v24 = vpop.permute.xlu0 %51  }
  0x83   :  { %55 = vst.msk [vmem:[#allocation0 + $0x1] sm:$0x1] %vm53_vm9, %v52_v24  }
  0x84   :  { %v72_v27 = vpop.permute.xlu1 %71  }
  0x85   :  { %74 = vst.msk [vmem:[#allocation0] sm:$0x1] %vm73_vm12, %v72_v27  }
  0x86   :  { %v65_v26 = vpop.permute.xlu0 %64  }
  0x87   :  { %68 = vst.msk [vmem:[#allocation0 + $0x1] sm:$0x1] %vm66_vm11, %v65_v26  }
  0x88   :  { %v85_v29 = vpop.permute.xlu1 %84  }
  0x89   :  { %87 = vst.msk [vmem:[#allocation0] sm:$0x1] %vm86_vm14, %v85_v29  }
  0x8a   :  { %v78_v28 = vpop.permute.xlu0 %77  }
  0x8b   :  { %81 = vst.msk [vmem:[#allocation0 + $0x1] sm:$0x1] %vm79_vm13, %v78_v28  }
  0x8c   :  { %v98_v31 = vpop.permute.xlu1 %97  }
  0x8d   :  { %100 = vst.msk [vmem:[#allocation0] sm:$0x1] %vm99_vm0, %v98_v31  }
  0x8e   :  { %v91_v30 = vpop.permute.xlu0 %90  }
  0x8f   :  { %94 = vst.msk [vmem:[#allocation0 + $0x1] sm:$0x1] %vm92_vm15, %v91_v30  }
  0x92   :  { %v104_v32 = vpop.permute.xlu0 %103  }
  0x93   :  { %107 = vst.msk [vmem:[#allocation0 + $0x1] sm:$0x1] %vm105_vm1, %v104_v32  }
  0x9a   :  { %v111_v33 = vld [vmem:[#allocation0] sm:$0x3] }
  0x9b   :  { %113 = vst [vmem:[%s225_s1] sm:$0x3] %v111_v33 }

// kernel: tile.46
= control target key start
LH: loop header
LB: loop body
LE: loop exit
PB: predicated region body
PF: predicated region fallthrough
CT: control target
= control target key end

     0   :  { %s28_s0 = inlined_call_operand.vmem [shape: f32[16], index: 0, kind: input, shape index: {}]   ;;  %s29_s1 = inlined_call_operand.vmem [shape: f32[16,16], index: 1, kind: output, shape index: {}]  }
   0x1   :  { %v4_v0 = vld [vmem:[%s28_s0] ss:$0 sm:$0xff] }
   0x2   :  { %5 = vst [vmem:[%s29_s1] sm:$0xff] %v4_v0  ;;  %8 = vst [vmem:[%s29_s1 + $0x8] sm:$0xff] %v4_v0 }

// kernel: tile.47
= control target key start
LH: loop header
LB: loop body
LE: loop exit
PB: predicated region body
PF: predicated region fallthrough
CT: control target
= control target key end

     0   :  { %s7_s6 = smov 3  ;;  %s21_s9 = smov 3  ;;  %vm4_vm0 = vcmask 130048   ;;  %vm11_vm1 = vcmask 1048448   ;;  %vm18_vm2 = vcmask 917248   ;;  %vm25_vm3 = vcmask 786048   ;;  %s119_s0 = inlined_call_operand.vmem [shape: f32[16,16], index: 0, kind: input, shape index: {}]   ;;  %s120_s1 = inlined_call_operand.vmem [shape: f32[256], index: 1, kind: output, shape index: {}]  }
   0x1   :  { %v61_v0 = vld [vmem:[%s119_s0 + $0x7] ss:$8 sm:%s7_s6]   ;;  %s75_s10 = smov 112   ;;  %v63_v1 = vld [vmem:[%s119_s0 + $0x5] ss:$8 sm:%s21_s9]   ;;  %s14_s13 = smov 3 }
   0x2   :  { %9 = vrot.lane.b32.xlu0 %v61_v0, %s75_s10  ;;  %s76_s14 = smov 80   ;;  %v62_v2 = vld [vmem:[%s119_s0 + $0x6] ss:$8 sm:%s14_s13]   ;;  %s28_s17 = smov 3  ;;  %vm32_vm4 = vcmask 654848   ;;  %vm39_vm5 = vcmask 523648  }
   0x3   :  { %23 = vrot.lane.b32.xlu1 %v63_v1, %s76_s14  ;;  %v64_v3 = vld [vmem:[%s119_s0 + $0x4] ss:$8 sm:%s28_s17]   ;;  %s35_s20 = smov 3  ;;  %s42_s21 = smov 3  ;;  %vm46_vm6 = vcmask 392448   ;;  %vm53_vm7 = vcmask 261248  }
   0x4   :  { %s77_s22 = smov 96   ;;  %s78_s23 = smov 64   ;;  %v65_v4 = vld [vmem:[%s119_s0 + $0x3] ss:$8 sm:%s35_s20]   ;;  %v66_v5 = vld [vmem:[%s119_s0 + $0x2] ss:$8 sm:%s42_s21]  }
   0x5   :  { %s2_s26 = smov 3  ;;  %s49_s29 = smov 3 }
   0x6   :  { %16 = vrot.lane.b32.xlu0 %v62_v2, %s77_s22  ;;  %v3_v6 = vld [vmem:[%s119_s0] ss:$8 sm:%s2_s26]   ;;  %s79_s3 = smov 48   ;;  %s80_s4 = smov 32  }
   0x7   :  { %30 = vrot.lane.b32.xlu1 %v64_v3, %s78_s23  ;;  %5 = vst.msk [vmem:[#allocation0] sm:$0x3] %vm4_vm0, %v3_v6   ;;  %v67_v7 = vld [vmem:[%s119_s0 + $0x1] ss:$8 sm:%s49_s29]   ;;  %s81_s0 = smov 16  }
   0xa   :  { %37 = vrot.lane.b32.xlu0 %v65_v4, %s79_s3 }
   0xb   :  { %44 = vrot.lane.b32.xlu1 %v66_v5, %s80_s4 }
   0xe   :  { %51 = vrot.lane.b32.xlu0 %v67_v7, %s81_s0 }
  0x74   :  { %v10_v8 = vpop.permute.xlu0 %9  }
  0x75   :  { %12 = vst.msk [vmem:[#allocation0] sm:$0x3] %vm11_vm1, %v10_v8   ;;  %v24_v9 = vpop.permute.xlu1 %23  }
  0x78   :  { %v17_v10 = vpop.permute.xlu0 %16  }
  0x79   :  { %19 = vst.msk [vmem:[#allocation0] sm:$0x3] %vm18_vm2, %v17_v10   ;;  %v31_v11 = vpop.permute.xlu1 %30  }
  0x7a   :  { %26 = vst.msk [vmem:[#allocation0] sm:$0x3] %vm25_vm3, %v24_v9  }
  0x7b   :  { %33 = vst.msk [vmem:[#allocation0] sm:$0x3] %vm32_vm4, %v31_v11  }
  0x7c   :  { %v38_v12 = vpop.permute.xlu0 %37  }
  0x7d   :  { %40 = vst.msk [vmem:[#allocation0] sm:$0x3] %vm39_vm5, %v38_v12   ;;  %v45_v13 = vpop.permute.xlu1 %44  }
  0x7e   :  { %47 = vst.msk [vmem:[#allocation0] sm:$0x3] %vm46_vm6, %v45_v13  }
  0x80   :  { %v52_v14 = vpop.permute.xlu0 %51  }
  0x81   :  { %54 = vst.msk [vmem:[#allocation0] sm:$0x3] %vm53_vm7, %v52_v14  }
  0x88   :  { %v58_v15 = vld [vmem:[#allocation0] sm:$0x3] }
  0x89   :  { %60 = vst [vmem:[%s120_s1] sm:$0x3] %v58_v15 }

// kernel: scm_forward.1
= control target key start
LH: loop header
LB: loop body
LE: loop exit
PB: predicated region body
PF: predicated region fallthrough
CT: control target
= control target key end

     0   :  { %s2581_s13 = smov 0   ;;  %s3063_s0 = inlined_call_operand.vmem [shape: f32[2,16,48], index: 0, kind: input, shape index: {}]   ;;  %s3064_s1 = inlined_call_operand.vmem [shape: f32[2,16,128], index: 1, kind: input, shape index: {}]   ;;  %s3065_s2 = inlined_call_operand.vmem [shape: bf16[3,48,64], index: 2, kind: input, shape index: {}]   ;;  %s3066_s3 = inlined_call_operand.vmem [shape: bf16[64,128], index: 3, kind: input, shape index: {}]   ;;  %s3067_s4 = inlined_call_operand.vmem [shape: bf16[3,128,128], index: 4, kind: input, shape index: {}]   ;;  %s3068_s5 = inlined_call_operand.vmem [shape: bf16[3,128,128], index: 5, kind: input, shape index: {}]   ;;  %s3069_s6 = inlined_call_operand.vmem [shape: bf16[128,208], index: 6, kind: input, shape index: {}]   ;;  %s3070_s7 = inlined_call_operand.vmem [shape: bf16[48,256], index: 7, kind: input, shape index: {}]   ;;  %s3071_s8 = inlined_call_operand.vmem [shape: bf16[208,256], index: 8, kind: input, shape index: {}]   ;;  %s3072_s9 = inlined_call_operand.vmem [shape: f32[1,1024], index: 9, kind: input, shape index: {}]   ;;  %s3073_s10 = inlined_call_operand.vmem [shape: f32[2,16,256], index: 10, kind: output, shape index: {}]  }
   0x1 LB: > { %s1923_s14 = sadd.s32 4294967295, %s2521_s13   ;;  %p1927_p0 = scmp.ge.s32.totalorder %s2521_s13, 1  ;;  %s2521_s13 = sphi %s2581_s13, %s20_s13  }
   0x2   : > { %p322_p1 = scmp.lt.s32.totalorder %s2521_s13, 3 }
   0x4   : > { %p323_p2 = pnand %p1927_p0, %p322_p1 }
   0x5   : > { %v2382_v0 = vld [vmem:[%s3065_s2 + $0x18] sm:$0xff] (!%p323_p2)   ;;  %v2523_v1 = vmov (!%p323_p2), 0.0   ;;  %v2383_v2 = vld [vmem:[%s3065_s2] sm:$0xff] (!%p323_p2)   ;;  %vm2524_vm0 = vmmov (!%p323_p2), 0   ;;  %p365_p3 = scmp.lt.s32.totalorder (!%p323_p2), %s1923_s14, 1  ;;  %v2385_v4 = vld [vmem:[%s3065_s2 + $0x8] sm:$0xff] (!%p323_p2)  }
   0x6   : > { %326 = sbr.rel (%p323_p2) target bundleno = 1443 (0x5a3), region = 60  ;;  %2205 = vmatprep.subr.bf16.mxu0 (!%p323_p2), %v2523_v1  ;;  %384 = vst [vmem:[#allocation3] sm:$0x1] (!%p323_p2), %v2523_v1  ;;  %385 = vst [vmem:[#allocation3 + $0x11] sm:$0x1] (!%p323_p2), %v2523_v1  ;;  %2215 = vmatprep.subr.bf16.mxu1 (!%p323_p2), %v2523_v1  ;;  %v2384_v3 = vld [vmem:[%s3065_s2 + $0x20] sm:$0xff] (!%p323_p2)  }
   0x7   : > { %2206 = vmatpush3.bf16.msra.mxu0 (!%p323_p2), %v2382_v0  ;;  %2211 = vmatprep.mubr.msk.bf16.mxu0 (!%p323_p2), %vm2524_vm0, %v2523_v1  ;;  %vm390_vm1 = vcmask (!%p323_p2), 392192   ;;  %vm381_vm2 = vcmask (!%p323_p2), 385024   ;;  %v2386_v5 = vld [vmem:[%s3065_s2 + $0x28] sm:$0xff] (!%p323_p2)   ;;  %v2387_v6 = vld [vmem:[%s3065_s2 + $0x10] sm:$0xff] (!%p323_p2)   ;;  %v2389_v16 = vld [vmem:[%s3065_s2 + $0x38] sm:$0xff] (!%p323_p2)   ;;  %vm661_vm3 = vcmask (!%p323_p2), 523264  }
   0x8   : > { %2216 = vmatpush3.bf16.msra.mxu1 (!%p323_p2), %v2383_v2  ;;  %2207 = vmatprep.subr.bf16.mxu0 (!%p323_p2), %v2523_v1  ;;  %382 = vst.msk [vmem:[#allocation2] sm:$0x1] (!%p323_p2), %vm381_vm2, %v2523_v1  ;;  %383 = vst.msk [vmem:[#allocation2 + $0x11] sm:$0x1] (!%p323_p2), %vm381_vm2, %v2523_v1  ;;  %v2388_v9 = vld [vmem:[%s3065_s2 + $0x30] sm:$0xff] (!%p323_p2)   ;;  %v2390_v17 = vld [vmem:[%s3065_s2 + $0x40] sm:$0xff] (!%p323_p2)  }
   0x9   : > { %2217 = vmatprep.subr.bf16.mxu1 (!%p323_p2), %v2523_v1  ;;  %2221 = vmatprep.mubr.msk.bf16.mxu1 (!%p323_p2), %vm2524_vm0, %v2523_v1  ;;  %v2391_v21 = vld [vmem:[%s3066_s3] sm:$0xff] (!%p323_p2)   ;;  %v2392_v22 = vld [vmem:[%s3066_s3 + $0x8] sm:$0xff] (!%p323_p2)   ;;  %v2393_v23 = vld [vmem:[%s3066_s3 + $0x10] sm:$0xff] (!%p323_p2)   ;;  %vm1713_vm4 = vcmask (!%p323_p2), 654336  }
   0xa   : > { %v2394_v24 = vld [vmem:[%s3066_s3 + $0x18] sm:$0xff] (!%p323_p2)   ;;  %v2396_v25 = vld [vmem:[%s3067_s4] sm:$0xff] (!%p323_p2)   ;;  %v2398_v26 = vld [vmem:[%s3067_s4 + $0x8] sm:$0xff] (!%p323_p2)  }
   0xb   : > { %2208 = vmatpush3.bf16.msra.mxu0 (!%p323_p2), %v2384_v3  ;;  %v2400_v27 = vld [vmem:[%s3067_s4 + $0x10] sm:$0xff] (!%p323_p2)   ;;  %v2402_v28 = vld [vmem:[%s3067_s4 + $0x18] sm:$0xff] (!%p323_p2)   ;;  %v1958_v39 = vld [vmem:[%s3072_s9] ss:$0 sm:$0xff] (!%p323_p2) }
   0xc   : > { %2218 = vmatpush3.bf16.msra.mxu1 (!%p323_p2), %v2385_v4  ;;  %2209 = vmatprep.subr.bf16.mxu0 (!%p323_p2), %v2523_v1  ;;  %v2395_v50 = vld [vmem:[%s3067_s4 + $0x40] sm:$0xff] (!%p323_p2)   ;;  %v2397_v52 = vld [vmem:[%s3067_s4 + $0x48] sm:$0xff] (!%p323_p2)   ;;  %v2399_v53 = vld [vmem:[%s3067_s4 + $0x50] sm:$0xff] (!%p323_p2)  }
   0xd   : > { %s3075_s14 = smov (!%p365_p3, %s1923_s14), 1  ;;  %2219 = vmatprep.subr.bf16.mxu1 %v2523_v1  ;;  %v2401_v54 = vld [vmem:[%s3067_s4 + $0x58] sm:$0xff]   ;;  %v2403_v55 = vld [vmem:[%s3067_s4 + $0x60] sm:$0xff]   ;;  %v2405_v56 = vld [vmem:[%s3067_s4 + $0x68] sm:$0xff]  }
   0xe   : > { %s2131_s25 = sshll.u32 %s3075_s14, 4  ;;  %v2407_v57 = vld [vmem:[%s3067_s4 + $0x70] sm:$0xff]   ;;  %v2404_v58 = vld [vmem:[%s3067_s4 + $0x20] sm:$0xff]   ;;  %v2409_v59 = vld [vmem:[%s3067_s4 + $0x78] sm:$0xff]   ;;  %s2133_s23 = sshll.u32 %s3075_s14, 5 }
   0xf   : > { %s369_s30 = scalar_lea.vmem %s3063_s0, %s2131_s25  ;;  %2210 = vmatpush3.bf16.msra.mxu0 %v2386_v5  ;;  %v2406_v60 = vld [vmem:[%s3067_s4 + $0x28] sm:$0xff]   ;;  %v2408_v61 = vld [vmem:[%s3067_s4 + $0x30] sm:$0xff]   ;;  %v2410_v62 = vld [vmem:[%s3067_s4 + $0x38] sm:$0xff]   ;;  %s374_s11 = scalar_lea.vmem %s3064_s1, %s2131_s25 }
  0x10   : > { %v2629_v7 = vld [vmem:[%s369_s30] sm:$0xff]  ;;  %v2631_v8 = vld [vmem:[%s369_s30 + $0x8] sm:$0xff]  ;;  %2220 = vmatpush3.bf16.msra.mxu1 %v2387_v6  ;;  %2225 = vmatprep.subr.bf16.mxu0 %v2523_v1  ;;  %s379_s27 = scalar_lea.vmem %s3073_s10, %s2133_s23 }
  0x11   : > { %391 = vst.msk [vmem:[#allocation2 + $0x1] sm:$0xff] %vm390_vm1, %v2629_v7  ;;  %392 = vst.msk [vmem:[#allocation2 + $0x9] sm:$0xff] %vm390_vm1, %v2631_v8  ;;  %2267 = vmatprep.subr.bf16.mxu1 %v2523_v1  ;;  %v1959_v63 = vld [vmem:[%s3072_s9 + $0x1] ss:$0 sm:$0xff] }
  0x18   : > { %v403_v10 = vld [vmem:[#allocation2 + $0x1] sm:$0xff]  ;;  %v404_v11 = vld [vmem:[#allocation2 + $0x9] sm:$0xff] }
  0x19   : > { %v394_v12 = vld [vmem:[#allocation2] sm:$0xff]  ;;  %v405_v13 = vpack.c.bf16 %v404_v11, %v403_v10  ;;  %v395_v14 = vld [vmem:[#allocation2 + $0x8] sm:$0xff] }
  0x1a   : > { %v396_v15 = vpack.c.bf16 %v395_v14, %v394_v12  ;;  %v537_v18 = vld [vmem:[#allocation2 + $0x2] sm:$0xff]  ;;  %v538_v19 = vld [vmem:[#allocation2 + $0xa] sm:$0xff] }
  0x1b   : > { %2212 = vmatmul.mubr.msk.bf16.vlgmr.msra.gmra.mrb[0].mxu0 %vm390_vm1, %v405_v13  ;;  %v539_v20 = vpack.c.bf16 %v538_v19, %v537_v18  ;;  %v2411_v11 = vld [vmem:[%s3067_s4 + $0x80] sm:$0xff]   ;;  %v2412_v13 = vld [vmem:[%s3067_s4 + $0x88] sm:$0xff]   ;;  %v2414_v18 = vld [vmem:[%s3067_s4 + $0x98] sm:$0xff]  }
  0x1c   : > { %2222 = vmatmul.mubr.msk.bf16.vlgmr.msra.gmra.mrb[0].mxu1 %vm390_vm1, %v396_v15  ;;  %2226 = vmatpush3.bf16.msra.mxu0 %v2388_v9  ;;  %v2415_v19 = vld [vmem:[%s3067_s4 + $0xa0] sm:$0xff]  }
  0x1d   : > { %2227 = vmatprep.subr.bf16.mxu0 %v2523_v1  ;;  %2231 = vmatprep.mubr.msk.bf16.mxu0 %vm2524_vm0, %v2523_v1 }
  0x1e   : > { %2283 = vmatprep.mubr.msk.bf16.mxu1 %vm2524_vm0, %v2523_v1  ;;  %2268 = vmatpush3.bf16.msra.mxu1 %v2396_v25 }
  0x1f   : > { %2269 = vmatprep.subr.bf16.mxu1 %v2523_v1 }
  0x20   : > { %2228 = vmatpush3.bf16.msra.mxu0 %v2389_v16  ;;  %v2413_v16 = vld [vmem:[%s3067_s4 + $0x90] sm:$0xff]  }
  0x21   : > { %2229 = vmatprep.subr.bf16.mxu0 %v2523_v1 }
  0x22   : > { %2270 = vmatpush3.bf16.msra.mxu1 %v2398_v26  ;;  %v2419_v26 = vld [vmem:[%s3068_s5 + $0x40] sm:$0xff]  }
  0x23   : > { %2271 = vmatprep.subr.bf16.mxu1 %v2523_v1 }
  0x24   : > { %2230 = vmatpush3.bf16.msra.mxu0 %v2390_v17 }
  0x25   : > { %2235 = vmatprep.subr.bf16.mxu0 %v2523_v1 }
  0x26   : > { %2272 = vmatpush3.bf16.msra.mxu1 %v2400_v27  ;;  %v2420_v27 = vld [vmem:[%s3068_s5] sm:$0xff]  }
  0x27   : > { %2232 = vmatmul.mubr.msk.bf16.vlgmr.msra.gmra.mrb[4].mxu0 %vm390_vm1, %v539_v20  ;;  %2273 = vmatprep.subr.bf16.mxu1 %v2523_v1  ;;  %v2416_v20 = vld [vmem:[%s3067_s4 + $0xa8] sm:$0xff]  }
  0x28   : > { %2243 = vmatprep.mubr.msk.bf16.mxu0 %vm2524_vm0, %v2523_v1  ;;  %2236 = vmatpush3.bf16.msra.mxu0 %v2391_v21  ;;  %v2417_v21 = vld [vmem:[%s3067_s4 + $0xb0] sm:$0xff]  }
  0x29   : > { %2237 = vmatprep.subr.bf16.mxu0 %v2523_v1 }
  0x2a   : > { %2274 = vmatpush3.bf16.msra.mxu1 %v2402_v28  ;;  %v2421_v28 = vld [vmem:[%s3068_s5 + $0x48] sm:$0xff]  }
  0x2b   : > { %2275 = vmatprep.subr.bf16.mxu1 %v2523_v1 }
  0x2c   : > { %2238 = vmatpush3.bf16.msra.mxu0 %v2392_v22  ;;  %v2418_v22 = vld [vmem:[%s3067_s4 + $0xb8] sm:$0xff]  }
  0x2d   : > { %2239 = vmatprep.subr.bf16.mxu0 %v2523_v1 }
  0x2e   : > { %2276 = vmatpush3.bf16.msra.mxu1 %v2404_v58 }
  0x2f   : > { %2277 = vmatprep.subr.bf16.mxu1 %v2523_v1 }
  0x30   : > { %2240 = vmatpush3.bf16.msra.mxu0 %v2393_v23 }
  0x31   : > { %2241 = vmatprep.subr.bf16.mxu0 %v2523_v1 }
  0x32   : > { %2278 = vmatpush3.bf16.msra.mxu1 %v2406_v60  ;;  %v2857_v60 = vld [vmem:[%s374_s11] sm:$0xff] }
  0x33   : > { %2279 = vmatprep.subr.bf16.mxu1 %v2523_v1 }
  0x34   : > { %2242 = vmatpush3.bf16.msra.mxu0 %v2394_v24 }
  0x35   : > { %2247 = vmatprep.subr.bf16.mxu0 %v2523_v1 }
  0x36   : > { %2280 = vmatpush3.bf16.msra.mxu1 %v2408_v61 }
  0x37   : > { %2281 = vmatprep.subr.bf16.mxu1 %v2523_v1 }
  0x3a   : > { %2282 = vmatpush3.bf16.msra.mxu1 %v2410_v62 }
  0x3b   : > { %2307 = vmatprep.subr.bf16.mxu1 %v2523_v1 }
  0xee   : > { %v468_v29 = vpop.f32.mrb[0].mxu0 }
  0xef   : > { %v530_v30 = vpop.f32.mrb[0].mxu1  ;;  %v2213_v31 = vpop.f32.mrb[1].mxu0 }
  0xf0   : > { %v531_v32 = vadd.f32 %v530_v30, %v468_v29  ;;  %v2223_v33 = vpop.f32.mrb[1].mxu1  ;;  %v471_v34 = vpop.f32.mrb[2].mxu0  ;;  %v2422_v29 = vld [vmem:[%s3068_s5 + $0x8] sm:$0xff]   ;;  %v2423_v30 = vld [vmem:[%s3068_s5 + $0x50] sm:$0xff]  }
  0xf1   : > { %v533_v35 = vpop.f32.mrb[2].mxu1  ;;  %v2214_v36 = vpop.f32.mrb[3].mxu0  ;;  %v2424_v31 = vld [vmem:[%s3068_s5 + $0x10] sm:$0xff]   ;;  %v2427_v33 = vld [vmem:[%s3068_s5 + $0x60] sm:$0xff]  }
  0xf2   : > { %v534_v37 = vadd.f32 %v533_v35, %v471_v34  ;;  %v2224_v38 = vpop.f32.mrb[3].mxu1  ;;  %v2429_v34 = vld [vmem:[%s3068_s5 + $0x68] sm:$0xff]   ;;  %v2426_v35 = vld [vmem:[%s3068_s5 + $0x18] sm:$0xff]   ;;  %v2431_v36 = vld [vmem:[%s3068_s5 + $0x70] sm:$0xff]  }
  0xf3   : > { %v2433_v38 = vld [vmem:[%s3068_s5 + $0x78] sm:$0xff]  }
  0xfa   : > { %v602_v40 = vpop.f32.mrb[4].mxu0 }
  0xfb   : > { %v609_v41 = vadd.f32 %v602_v40, %v531_v32  ;;  %v2233_v42 = vpop.f32.mrb[5].mxu0  ;;  %v2425_v32 = vld [vmem:[%s3068_s5 + $0x58] sm:$0xff]   ;;  %v2432_v40 = vld [vmem:[%s3068_s5 + $0x30] sm:$0xff]  }
  0xfc   : > { %v605_v43 = vpop.f32.mrb[6].mxu0 }
  0xfd   : > { %v617_v44 = vadd.f32 %v1958_v39, %v609_v41  ;;  %v610_v45 = vadd.f32 %v605_v43, %v534_v37  ;;  %v2234_v46 = vpop.f32.mrb[7].mxu0  ;;  %v2428_v37 = vld [vmem:[%s3068_s5 + $0x20] sm:$0xff]   ;;  %v2434_v41 = vld [vmem:[%s3068_s5 + $0x38] sm:$0xff]  }
  0xff   : > { %v618_v47 = vadd.f32 %v1958_v39, %v610_v45  ;;  %v619_v48 = vmax.f32 %v617_v44, 0.0  ;;  %v2430_v39 = vld [vmem:[%s3068_s5 + $0x28] sm:$0xff]  }
 0x101   : > { %v620_v49 = vmax.f32 %v618_v47, 0.0 }
 0x103   : > { %v621_v51 = vpack.c.bf16 %v620_v49, %v619_v48 }
 0x105   : > { %2244 = vmatmul.mubr.msk.bf16.vlgmr.msra.gmra.mrb[8].mxu0 %vm661_vm3, %v621_v51 }
 0x106   : > { %2248 = vmatpush3.bf16.msra.mxu0 %v2395_v50  ;;  %2263 = vmatprep.mubr.msk.bf16.mxu0 %vm2524_vm0, %v2523_v1 }
 0x107   : > { %2249 = vmatprep.subr.bf16.mxu0 %v2523_v1 }
 0x10a   : > { %2250 = vmatpush3.bf16.msra.mxu0 %v2397_v52  ;;  %v2021_v52 = vld [vmem:[%s3072_s9 + $0x2] ss:$0 sm:$0xff] }
 0x10b   : > { %2251 = vmatprep.subr.bf16.mxu0 %v2523_v1 }
 0x10e   : > { %2252 = vmatpush3.bf16.msra.mxu0 %v2399_v53 }
 0x10f   : > { %2253 = vmatprep.subr.bf16.mxu0 %v2523_v1 }
 0x112   : > { %2254 = vmatpush3.bf16.msra.mxu0 %v2401_v54 }
 0x113   : > { %2255 = vmatprep.subr.bf16.mxu0 %v2523_v1 }
 0x116   : > { %2256 = vmatpush3.bf16.msra.mxu0 %v2403_v55 }
 0x117   : > { %2257 = vmatprep.subr.bf16.mxu0 %v2523_v1 }
 0x11a   : > { %2258 = vmatpush3.bf16.msra.mxu0 %v2405_v56 }
 0x11b   : > { %2259 = vmatprep.subr.bf16.mxu0 %v2523_v1 }
 0x11e   : > { %2260 = vmatpush3.bf16.msra.mxu0 %v2407_v57 }
 0x11f   : > { %2261 = vmatprep.subr.bf16.mxu0 %v2523_v1 }
 0x122   : > { %2262 = vmatpush3.bf16.msra.mxu0 %v2409_v59 }
 0x123   : > { %2287 = vmatprep.subr.bf16.mxu0 %v2523_v1 }
 0x1d8   : > { %v699_v0 = vpop.f32.mrb[8].mxu0 }
 0x1d9   : > { %v700_v2 = vadd.f32 %v1959_v63, %v699_v0  ;;  %v2245_v3 = vpop.f32.mrb[9].mxu0 }
 0x1da   : > { %v702_v4 = vpop.f32.mrb[10].mxu0 }
 0x1db   : > { %v706_v5 = vmax.f32 %v700_v2, 0.0  ;;  %v703_v6 = vadd.f32 %v1959_v63, %v702_v4  ;;  %v2246_v9 = vpop.f32.mrb[11].mxu0  ;;  %v2859_v63 = vld [vmem:[%s374_s11 + $0x8] sm:$0xff]  ;;  %v2435_v4 = vld [vmem:[%s3068_s5 + $0x80] sm:$0xff]  }
 0x1dd   : > { %708 = vst [vmem:[#allocation3 + $0x1] sm:$0xff] %v706_v5  ;;  %v707_v10 = vmax.f32 %v703_v6, 0.0  ;;  %v2436_v6 = vld [vmem:[%s3068_s5 + $0x88] sm:$0xff]  }
 0x1df   : > { %709 = vst [vmem:[#allocation3 + $0x9] sm:$0xff] %v707_v10  ;;  %v732_v12 = vpack.c.bf16 %v707_v10, %v706_v5 }
 0x1e1   : > { %2264 = vmatmul.mubr.bf16.vlgmr.msra.gmra.mrb[12].mxu0 %v732_v12 }
 0x1e2   : > { %2288 = vmatpush3.bf16.msra.mxu0 %v2411_v11  ;;  %2303 = vmatprep.mubr.msk.bf16.mxu0 %vm2524_vm0, %v2523_v1  ;;  %v2437_v11 = vld [vmem:[%s3068_s5 + $0x90] sm:$0xff]  }
 0x1e3   : > { %2289 = vmatprep.subr.bf16.mxu0 %v2523_v1 }
 0x1e4   : > { %v711_v14 = vld [vmem:[#allocation3] sm:$0xff] }
 0x1e6   : > { %v712_v15 = vld [vmem:[#allocation3 + $0x8] sm:$0xff]  ;;  %2290 = vmatpush3.bf16.msra.mxu0 %v2412_v13  ;;  %v2438_v13 = vld [vmem:[%s3068_s5 + $0x98] sm:$0xff]  }
 0x1e7   : > { %v713_v17 = vpack.c.bf16 %v712_v15, %v711_v14  ;;  %2291 = vmatprep.subr.bf16.mxu0 %v2523_v1  ;;  %v928_v23 = vld [vmem:[#allocation3 + $0x2] sm:$0xff]  ;;  %v929_v24 = vld [vmem:[#allocation3 + $0xa] sm:$0xff] }
 0x1e8   : > { %v930_v25 = vpack.c.bf16 %v929_v24, %v928_v23  ;;  %v2439_v14 = vld [vmem:[%s3068_s5 + $0xa0] sm:$0xff]   ;;  %v2440_v15 = vld [vmem:[%s3068_s5 + $0xa8] sm:$0xff]   ;;  %v2448_v23 = vld [vmem:[%s3069_s6 + $0x14] ss:$8 sps:$4 sm:$0xff]  }
 0x1e9   : > { %2284 = vmatmul.mubr.bf16.vlgmr.msra.gmra.mrb[4].mxu1 %v713_v17  ;;  %v2442_v17 = vld [vmem:[%s3068_s5 + $0xb8] sm:$0xff]   ;;  %v2451_v24 = vld [vmem:[%s3069_s6 + $0x24] ss:$8 sps:$4 sm:$0xff]  }
 0x1ea   : > { %2292 = vmatpush3.bf16.msra.mxu0 %v2413_v16  ;;  %2323 = vmatprep.mubr.msk.bf16.mxu1 %vm2524_vm0, %v2523_v1  ;;  %v2441_v16 = vld [vmem:[%s3068_s5 + $0xb0] sm:$0xff]  }
 0x1eb   : > { %2293 = vmatprep.subr.bf16.mxu0 %v2523_v1  ;;  %2308 = vmatpush3.bf16.msra.mxu1 %v2419_v26  ;;  %v2454_v26 = vld [vmem:[%s3069_s6 + $0x34] ss:$8 sps:$4 sm:$0xff]  }
 0x1ec   : > { %2309 = vmatprep.subr.bf16.mxu1 %v2523_v1 }
 0x1ee   : > { %2294 = vmatpush3.bf16.msra.mxu0 %v2414_v18 }
 0x1ef   : > { %2295 = vmatprep.subr.bf16.mxu0 %v2523_v1  ;;  %2310 = vmatpush3.bf16.msra.mxu1 %v2421_v28  ;;  %v2457_v28 = vld [vmem:[%s3069_s6 + $0x44] ss:$8 sps:$4 sm:$0xff]  }
 0x1f0   : > { %2311 = vmatprep.subr.bf16.mxu1 %v2523_v1 }
 0x1f2   : > { %2296 = vmatpush3.bf16.msra.mxu0 %v2415_v19 }
 0x1f3   : > { %2297 = vmatprep.subr.bf16.mxu0 %v2523_v1  ;;  %2312 = vmatpush3.bf16.msra.mxu1 %v2423_v30  ;;  %v2460_v30 = vld [vmem:[%s3069_s6 + $0x54] ss:$8 sps:$4 sm:$0xff]  }
 0x1f4   : > { %2313 = vmatprep.subr.bf16.mxu1 %v2523_v1 }
 0x1f6   : > { %2298 = vmatpush3.bf16.msra.mxu0 %v2416_v20 }
 0x1f7   : > { %2299 = vmatprep.subr.bf16.mxu0 %v2523_v1  ;;  %2314 = vmatpush3.bf16.msra.mxu1 %v2425_v32  ;;  %v2463_v32 = vld [vmem:[%s3069_s6 + $0x64] ss:$8 sps:$4 sm:$0xff]  }
 0x1f8   : > { %2315 = vmatprep.subr.bf16.mxu1 %v2523_v1 }
 0x1fa   : > { %2300 = vmatpush3.bf16.msra.mxu0 %v2417_v21  ;;  %v2445_v21 = vld [vmem:[%s3069_s6 + $0x4] ss:$8 sps:$4 sm:$0xff]  }
 0x1fb   : > { %2301 = vmatprep.subr.bf16.mxu0 %v2523_v1  ;;  %2316 = vmatpush3.bf16.msra.mxu1 %v2427_v33  ;;  %v2461_v33 = vld [vmem:[%s3069_s6 + $0x60] ss:$8 sps:$4 sm:$0xff]  }
 0x1fc   : > { %2317 = vmatprep.subr.bf16.mxu1 %v2523_v1 }
 0x1fe   : > { %2302 = vmatpush3.bf16.msra.mxu0 %v2418_v22  ;;  %v2443_v22 = vld [vmem:[%s3069_s6] ss:$8 sps:$4 sm:$0xff]  }
 0x1ff   : > { %2327 = vmatprep.subr.bf16.mxu0 %v2523_v1  ;;  %2318 = vmatpush3.bf16.msra.mxu1 %v2429_v34  ;;  %v2466_v34 = vld [vmem:[%s3069_s6 + $0x74] ss:$8 sps:$4 sm:$0xff]  }
 0x200   : > { %2319 = vmatprep.subr.bf16.mxu1 %v2523_v1 }
 0x201   : > { %2304 = vmatmul.mubr.bf16.vlgmr.msra.gmra.mrb[16].mxu0 %v930_v25  ;;  %v2449_v25 = vld [vmem:[%s3069_s6 + $0x20] ss:$8 sps:$4 sm:$0xff]  }
 0x202   : > { %2343 = vmatprep.mubr.msk.bf16.mxu0 %vm2524_vm0, %v2523_v1  ;;  %2328 = vmatpush3.bf16.msra.mxu0 %v2420_v27  ;;  %v2452_v27 = vld [vmem:[%s3069_s6 + $0x30] ss:$8 sps:$4 sm:$0xff]  }
 0x203   : > { %2329 = vmatprep.subr.bf16.mxu0 %v2523_v1  ;;  %2320 = vmatpush3.bf16.msra.mxu1 %v2431_v36  ;;  %v2525_v36 = vmov 0  }
 0x204   : > { %2321 = vmatprep.subr.bf16.mxu1 %v2523_v1 }
 0x206   : > { %2330 = vmatpush3.bf16.msra.mxu0 %v2422_v29  ;;  %v2455_v29 = vld [vmem:[%s3069_s6 + $0x40] ss:$8 sps:$4 sm:$0xff]  }
 0x207   : > { %2331 = vmatprep.subr.bf16.mxu0 %v2523_v1  ;;  %2322 = vmatpush3.bf16.msra.mxu1 %v2433_v38  ;;  %v2469_v38 = vld [vmem:[%s3071_s8 + $0x4] ss:$8 sps:$4 sm:$0xff]  }
 0x208   : > { %2347 = vmatprep.subr.bf16.mxu1 %v2523_v1 }
 0x20a   : > { %2332 = vmatpush3.bf16.msra.mxu0 %v2424_v31  ;;  %v2458_v31 = vld [vmem:[%s3069_s6 + $0x50] ss:$8 sps:$4 sm:$0xff]  }
 0x20b   : > { %2333 = vmatprep.subr.bf16.mxu0 %v2523_v1 }
 0x20e   : > { %2334 = vmatpush3.bf16.msra.mxu0 %v2426_v35  ;;  %v2464_v35 = vld [vmem:[%s3069_s6 + $0x70] ss:$8 sps:$4 sm:$0xff]  }
 0x20f   : > { %2335 = vmatprep.subr.bf16.mxu0 %v2523_v1 }
 0x212   : > { %2336 = vmatpush3.bf16.msra.mxu0 %v2428_v37  ;;  %v2467_v37 = vld [vmem:[%s3071_s8] ss:$8 sps:$4 sm:$0xff]  }
 0x213   : > { %2337 = vmatprep.subr.bf16.mxu0 %v2523_v1 }
 0x216   : > { %2338 = vmatpush3.bf16.msra.mxu0 %v2430_v39  ;;  %v2472_v39 = vld [vmem:[%s3071_s8 + $0x14] ss:$8 sps:$4 sm:$0xff]  }
 0x217   : > { %2339 = vmatprep.subr.bf16.mxu0 %v2523_v1 }
 0x21a   : > { %2340 = vmatpush3.bf16.msra.mxu0 %v2432_v40  ;;  %v2470_v40 = vld [vmem:[%s3071_s8 + $0x10] ss:$8 sps:$4 sm:$0xff]  }
 0x21b   : > { %2341 = vmatprep.subr.bf16.mxu0 %v2523_v1 }
 0x21e   : > { %2342 = vmatpush3.bf16.msra.mxu0 %v2434_v41  ;;  %v2475_v41 = vld [vmem:[%s3071_s8 + $0x24] ss:$8 sps:$4 sm:$0xff]  }
 0x21f   : > { %1501 = vmatprep.subr.bf16.mxu0 %v2445_v21 }
 0x2b4   : > { %v832_v42 = vpop.f32.mrb[12].mxu0 }
 0x2b5   : > { %v2265_v43 = vpop.f32.mrb[13].mxu0 }
 0x2b6   : > { %v835_v44 = vpop.f32.mrb[14].mxu0  ;;  %v2478_v43 = vld [vmem:[%s3071_s8 + $0x34] ss:$8 sps:$4 sm:$0xff]  }
 0x2b7   : > { %v2266_v45 = vpop.f32.mrb[15].mxu0 }
 0x2b8   : > { %v2481_v45 = vld [vmem:[%s3071_s8 + $0x44] ss:$8 sps:$4 sm:$0xff]  }
 0x2bc   : > { %v921_v46 = vpop.f32.mrb[4].mxu1 }
 0x2bd   : > { %v922_v47 = vadd.f32 %v921_v46, %v832_v42  ;;  %v2285_v48 = vpop.f32.mrb[5].mxu1  ;;  %v2473_v42 = vld [vmem:[%s3071_s8 + $0x20] ss:$8 sps:$4 sm:$0xff]  }
 0x2be   : > { %v924_v49 = vpop.f32.mrb[6].mxu1  ;;  %v2479_v46 = vld [vmem:[%s3071_s8 + $0x40] ss:$8 sps:$4 sm:$0xff]   ;;  %v2482_v48 = vld [vmem:[%s3071_s8 + $0x50] ss:$8 sps:$4 sm:$0xff]  }
 0x2bf   : > { %v925_v50 = vadd.f32 %v924_v49, %v835_v44  ;;  %v2286_v51 = vpop.f32.mrb[7].mxu1  ;;  %v2476_v44 = vld [vmem:[%s3071_s8 + $0x30] ss:$8 sps:$4 sm:$0xff]   ;;  %v2487_v49 = vld [vmem:[%s3071_s8 + $0x64] ss:$8 sps:$4 sm:$0xff]  }
 0x2c0   : > { %v2490_v51 = vld [vmem:[%s3071_s8 + $0x74] ss:$8 sps:$4 sm:$0xff]  }
 0x2d4   : > { %v1030_v53 = vpop.f32.mrb[16].mxu0 }
 0x2d5   : > { %v1037_v54 = vadd.f32 %v1030_v53, %v922_v47  ;;  %v2305_v55 = vpop.f32.mrb[17].mxu0  ;;  %v2484_v47 = vld [vmem:[%s3071_s8 + $0x54] ss:$8 sps:$4 sm:$0xff]   ;;  %v2493_v53 = vld [vmem:[%s3071_s8 + $0x84] ss:$8 sps:$4 sm:$0xff]  }
 0x2d6   : > { %v1033_v56 = vpop.f32.mrb[18].mxu0  ;;  %v2496_v55 = vld [vmem:[%s3071_s8 + $0x94] ss:$8 sps:$4 sm:$0xff]  }
 0x2d7   : > { %v1045_v57 = vadd.f32 %v2021_v52, %v1037_v54  ;;  %v1038_v58 = vadd.f32 %v1033_v56, %v925_v50  ;;  %v2306_v59 = vpop.f32.mrb[19].mxu0  ;;  %v2485_v50 = vld [vmem:[%s3071_s8 + $0x60] ss:$8 sps:$4 sm:$0xff]   ;;  %v2494_v56 = vld [vmem:[%s3071_s8 + $0x90] ss:$8 sps:$4 sm:$0xff]  }
 0x2d8   : > { %v2491_v54 = vld [vmem:[%s3071_s8 + $0x80] ss:$8 sps:$4 sm:$0xff]  }
 0x2d9   : > { %v1047_v61 = vmax.f32 %v1045_v57, 0.0  ;;  %v1046_v62 = vadd.f32 %v2021_v52, %v1038_v58  ;;  %v2488_v52 = vld [vmem:[%s3071_s8 + $0x70] ss:$8 sps:$4 sm:$0xff]   ;;  %v2499_v57 = vld [vmem:[%s3071_s8 + $0xa4] ss:$8 sps:$4 sm:$0xff]  }
 0x2da   : > { %v2497_v58 = vld [vmem:[%s3071_s8 + $0xa0] ss:$8 sps:$4 sm:$0xff]  }
 0x2db   : > { %v1049_v0 = vmul.f32 %v1047_v61, %v2857_v60  ;;  %v1048_v2 = vmax.f32 %v1046_v62, 0.0 }
 0x2dd   : > { %1051 = vst [vmem:[#allocation3 + $0x1] sm:$0xff] %v1049_v0  ;;  %v1050_v3 = vmul.f32 %v1048_v2, %v2859_v63 }
 0x2df   : > { %1052 = vst [vmem:[#allocation3 + $0x9] sm:$0xff] %v1050_v3  ;;  %v1075_v5 = vpack.c.bf16 %v1050_v3, %v1049_v0 }
 0x2e1   : > { %2324 = vmatmul.mubr.bf16.vlgmr.msra.gmra.mrb[8].mxu1 %v1075_v5 }
 0x2e2   : > { %2348 = vmatpush3.bf16.msra.mxu1 %v2435_v4  ;;  %2363 = vmatprep.mubr.msk.bf16.mxu1 %vm2524_vm0, %v2523_v1 }
 0x2e3   : > { %2349 = vmatprep.subr.bf16.mxu1 %v2523_v1 }
 0x2e4   : > { %v1054_v9 = vld [vmem:[#allocation3] sm:$0xff] }
 0x2e6   : > { %v1055_v10 = vld [vmem:[#allocation3 + $0x8] sm:$0xff]  ;;  %2350 = vmatpush3.bf16.msra.mxu1 %v2436_v6 }
 0x2e7   : > { %v1056_v12 = vpack.c.bf16 %v1055_v10, %v1054_v9  ;;  %2351 = vmatprep.subr.bf16.mxu1 %v2523_v1  ;;  %v1271_v18 = vld [vmem:[#allocation3 + $0x2] sm:$0xff]  ;;  %v1272_v19 = vld [vmem:[#allocation3 + $0xa] sm:$0xff] }
 0x2e8   : > { %v1273_v20 = vpack.c.bf16 %v1272_v19, %v1271_v18  ;;  %v2078_v10 = vld [vmem:[%s3072_s9 + $0x3] ss:$0 sm:$0xff] }
 0x2e9   : > { %2344 = vmatmul.mubr.bf16.vlgmr.msra.gmra.mrb[20].mxu0 %v1056_v12 }
 0x2ea   : > { %2352 = vmatpush3.bf16.msra.mxu1 %v2437_v11  ;;  %1502 = vmatpush1.bf16.msra.mxu0 %v2443_v22  ;;  %v2502_v22 = vld [vmem:[%s3071_s8 + $0xb4] ss:$8 sps:$4 sm:$0xff]  }
 0x2eb   : > { %2353 = vmatprep.subr.bf16.mxu1 %v2523_v1  ;;  %1503 = vmatprep.subr.bf16.mxu0 %v2448_v23  ;;  %v2500_v23 = vld [vmem:[%s3071_s8 + $0xb0] ss:$8 sps:$4 sm:$0xff]  }
 0x2ec   : > { %1533 = vmatprep.mubr.bf16.mxu0 %v2525_v36 }
 0x2ee   : > { %2354 = vmatpush3.bf16.msra.mxu1 %v2438_v13 }
 0x2ef   : > { %2355 = vmatprep.subr.bf16.mxu1 %v2523_v1 }
 0x2f2   : > { %2356 = vmatpush3.bf16.msra.mxu1 %v2439_v14 }
 0x2f3   : > { %2357 = vmatprep.subr.bf16.mxu1 %v2523_v1 }
 0x2f6   : > { %2358 = vmatpush3.bf16.msra.mxu1 %v2440_v15 }
 0x2f7   : > { %2359 = vmatprep.subr.bf16.mxu1 %v2523_v1 }
 0x2fa   : > { %2360 = vmatpush3.bf16.msra.mxu1 %v2441_v16 }
 0x2fb   : > { %2361 = vmatprep.subr.bf16.mxu1 %v2523_v1  ;;  %v2446_v1 = vld [vmem:[%s3069_s6 + $0x10] ss:$8 sps:$4 sm:$0xff]  }
 0x2fc   : > { %1504 = vmatpush1.bf16.msra.mxu0 %v2446_v1  ;;  %v2505_v1 = vld [vmem:[%s3071_s8 + $0xc4] ss:$8 sps:$4 sm:$0xff]  }
 0x2fd   : > { %1505 = vmatprep.subr.bf16.mxu0 %v2451_v24  ;;  %v1411_v24 = vlaneseq }
 0x2fe   : > { %2362 = vmatpush3.bf16.msra.mxu1 %v2442_v17 }
 0x2ff   : > { %1717 = vmatprep.subr.bf16.mxu1 %v2469_v38 }
 0x300   : > { %1506 = vmatpush1.bf16.msra.mxu0 %v2449_v25  ;;  %v1412_v25 = vshrl.u32 %v1411_v24, 7 }
 0x301   : > { %2364 = vmatmul.mubr.bf16.vlgmr.msra.gmra.mrb[12].mxu1 %v1273_v20  ;;  %1507 = vmatprep.subr.bf16.mxu0 %v2454_v26 }
 0x302   : > { %1718 = vmatpush1.bf16.msra.mxu1 %v2467_v37  ;;  %v1413_v26 = vsub.s32 0, %v1412_v25 }
 0x303   : > { %1719 = vmatprep.subr.bf16.mxu1 %v2472_v39 }
 0x304   : > { %1508 = vmatpush1.bf16.msra.mxu0 %v2452_v27  ;;  %v1409_v27 = vld [vmem:[%s3072_s9 + $0x4] sm:$0x3] }
 0x305   : > { %1509 = vmatprep.subr.bf16.mxu0 %v2457_v28  ;;  %v1417_v28 = vsub.s32 1, %v1412_v25 }
 0x306   : > { %1720 = vmatpush1.bf16.msra.mxu1 %v2470_v40 }
 0x307   : > { %1721 = vmatprep.subr.bf16.mxu1 %v2475_v41 }
 0x308   : > { %1510 = vmatpush1.bf16.msra.mxu0 %v2455_v29  ;;  %v1414_v29 = vrot.slane %v1409_v27, %v1413_v26 }
 0x309   : > { %1511 = vmatprep.subr.bf16.mxu0 %v2460_v30  ;;  %v1418_v30 = vrot.slane %v1409_v27, %v1417_v28 }
 0x30a   : > { %1722 = vmatpush1.bf16.msra.mxu1 %v2473_v42 }
 0x30b   : > { %1723 = vmatprep.subr.bf16.mxu1 %v2478_v43 }
 0x30c   : > { %1512 = vmatpush1.bf16.msra.mxu0 %v2458_v31 }
 0x30d   : > { %1513 = vmatprep.subr.bf16.mxu0 %v2463_v32 }
 0x30e   : > { %1724 = vmatpush1.bf16.msra.mxu1 %v2476_v44 }
 0x30f   : > { %1725 = vmatprep.subr.bf16.mxu1 %v2481_v45 }
 0x310   : > { %1514 = vmatpush1.bf16.msra.mxu0 %v2461_v33 }
 0x311   : > { %1515 = vmatprep.subr.bf16.mxu0 %v2466_v34 }
 0x312   : > { %1726 = vmatpush1.bf16.msra.mxu1 %v2479_v46  ;;  %v2506_v46 = vld [vmem:[%s3070_s7] ss:$8 sps:$4 sm:$0xff]  }
 0x313   : > { %1727 = vmatprep.subr.bf16.mxu1 %v2484_v47  ;;  %v2511_v47 = vld [vmem:[%s3070_s7 + $0x14] ss:$8 sps:$4 sm:$0xff]  }
 0x314   : > { %1516 = vmatpush1.bf16.msra.mxu0 %v2464_v35 }
 0x316   : > { %1728 = vmatpush1.bf16.msra.mxu1 %v2482_v48  ;;  %v2509_v48 = vld [vmem:[%s3070_s7 + $0x10] ss:$8 sps:$4 sm:$0xff]  }
 0x317   : > { %1729 = vmatprep.subr.bf16.mxu1 %v2487_v49  ;;  %v2514_v49 = vld [vmem:[%s3070_s7 + $0x24] ss:$8 sps:$4 sm:$0xff]  }
 0x31a   : > { %1730 = vmatpush1.bf16.msra.mxu1 %v2485_v50  ;;  %v2512_v50 = vld [vmem:[%s3070_s7 + $0x20] ss:$8 sps:$4 sm:$0xff]  }
 0x31b   : > { %1731 = vmatprep.subr.bf16.mxu1 %v2490_v51  ;;  %v1548_v51 = vpack.c.bf16 %v2631_v8, %v2629_v7 }
 0x31e   : > { %1732 = vmatpush1.bf16.msra.mxu1 %v2488_v52 }
 0x31f   : > { %1733 = vmatprep.subr.bf16.mxu1 %v2493_v53 }
 0x322   : > { %1734 = vmatpush1.bf16.msra.mxu1 %v2491_v54 }
 0x323   : > { %1735 = vmatprep.subr.bf16.mxu1 %v2496_v55 }
 0x326   : > { %1736 = vmatpush1.bf16.msra.mxu1 %v2494_v56 }
 0x327   : > { %1737 = vmatprep.subr.bf16.mxu1 %v2499_v57 }
 0x32a   : > { %1738 = vmatpush1.bf16.msra.mxu1 %v2497_v58 }
 0x32b   : > { %1739 = vmatprep.subr.bf16.mxu1 %v2502_v22 }
 0x32e   : > { %1740 = vmatpush1.bf16.msra.mxu1 %v2500_v23 }
 0x32f   : > { %1741 = vmatprep.subr.bf16.mxu1 %v2505_v1 }
 0x3b4   : > { %v1175_v59 = vpop.f32.mrb[8].mxu1 }
 0x3b5   : > { %v2325_v61 = vpop.f32.mrb[9].mxu1 }
 0x3b6   : > { %v1178_v62 = vpop.f32.mrb[10].mxu1 }
 0x3b7   : > { %v2326_v0 = vpop.f32.mrb[11].mxu1 }
 0x3bc   : > { %v1264_v2 = vpop.f32.mrb[20].mxu0 }
 0x3bd   : > { %v1265_v3 = vadd.f32 %v1264_v2, %v1175_v59  ;;  %v2345_v4 = vpop.f32.mrb[21].mxu0 }
 0x3be   : > { %v1267_v5 = vpop.f32.mrb[22].mxu0 }
 0x3bf   : > { %v1268_v6 = vadd.f32 %v1267_v5, %v1178_v62  ;;  %v2346_v9 = vpop.f32.mrb[23].mxu0 }
 0x3d4   : > { %v1373_v11 = vpop.f32.mrb[12].mxu1 }
 0x3d5   : > { %v1380_v12 = vadd.f32 %v1373_v11, %v1265_v3  ;;  %v2365_v13 = vpop.f32.mrb[13].mxu1 }
 0x3d6   : > { %v1376_v14 = vpop.f32.mrb[14].mxu1 }
 0x3d7   : > { %v1388_v15 = vadd.f32 %v2078_v10, %v1380_v12  ;;  %v1381_v16 = vadd.f32 %v1376_v14, %v1268_v6  ;;  %v2366_v17 = vpop.f32.mrb[15].mxu1 }
 0x3d9   : > { %v1389_v18 = vadd.f32 %v2078_v10, %v1381_v16  ;;  %v1390_v19 = vadd.f32 %v1388_v15, %v2857_v60  ;;  %v2503_v60 = vld [vmem:[%s3071_s8 + $0xc0] ss:$8 sps:$4 sm:$0xff]  }
 0x3da   : > { %1742 = vmatpush1.bf16.msra.mxu1 %v2503_v60 }
 0x3db   : > { %v1391_v20 = vadd.f32 %v1389_v18, %v2859_v63  ;;  %v2508_v63 = vld [vmem:[%s3070_s7 + $0x4] ss:$8 sps:$4 sm:$0xff]  }
 0x3dc   : > { %1793 = vmatprep.subr.bf16.mxu1 %v2508_v63 }
 0x3dd   : > { %v1392_v21 = vpack.c.bf16 %v1391_v20, %v1390_v19 }
 0x3df   : > { %1534 = vmatmul.mubr.bf16.vlgmr.msra.gmra.mrb[24].mxu0 %v1392_v21 }
 0x4b2   : > { %v1535_v31 = vpop.f32.mrb[24].mxu0 }
 0x4b3   : > { %v1536_v32 = vadd.f32 %v1535_v31, %v1414_v29  ;;  %v1537_v33 = vpop.f32.mrb[25].mxu0 }
 0x4b4   : > { %v1538_v34 = vadd.f32 %v1537_v33, %v1418_v30  ;;  %v1539_v35 = vpop.f32.mrb[26].mxu0 }
 0x4b5   : > { %v1540_v37 = vadd.f32 %v1539_v35, %v1414_v29  ;;  %v1541_v38 = vpop.f32.mrb[27].mxu0  ;;  %v1544_v40 = vmax.f32 %v1536_v32, 0.0 }
 0x4b6   : > { %v1542_v39 = vadd.f32 %v1541_v38, %v1418_v30  ;;  %v1545_v42 = vmax.f32 %v1538_v34, 0.0 }
 0x4b7   : > { %v1546_v41 = vmax.f32 %v1540_v37, 0.0 }
 0x4b8   : > { %v1547_v43 = vmax.f32 %v1542_v39, 0.0 }
 0x4b9   : > { %v1555_v44 = vpack.c.bf16 %v1546_v41, %v1544_v40 }
 0x4ba   : > { %v1556_v45 = vpack.c.bf16 %v1547_v43, %v1545_v42 }
 0x4bc   : > { %2121 = vmatprep.mubr.msk.bf16.mxu1 %vm1713_vm4, %v1556_v45 }
 0x4bd   : > { %1750 = vmatmul.mubr.bf16.vlgmr.msra.gmra.mrb[16].mxu1 %v1555_v44 }
 0x4be   : > { %1794 = vmatpush1.bf16.msra.mxu1 %v2506_v46  ;;  %1825 = vmatprep.mubr.bf16.mxu1 %v2525_v36  ;;  %v1836_v36 = vld [vmem:[%s3072_s9 + $0x6] sm:$0x3] }
 0x4bf   : > { %1795 = vmatprep.subr.bf16.mxu1 %v2511_v47  ;;  %v1841_v52 = vrot.slane %v1836_v36, %v1413_v26  ;;  %v1845_v53 = vrot.slane %v1836_v36, %v1417_v28 }
 0x4c2   : > { %1796 = vmatpush1.bf16.msra.mxu1 %v2509_v48 }
 0x4c3   : > { %1797 = vmatprep.subr.bf16.mxu1 %v2514_v49 }
 0x4c6   : > { %1798 = vmatpush1.bf16.msra.mxu1 %v2512_v50 }
 0x4c9   : > { %2128 = vmatmul.mubr.msk.bf16.vlgmr.msra.gmra.mrb[16].mxu1 %vm390_vm1, %v1548_v51 }
 0x59c   : > { %v1827_v54 = vpop.f32.mrb[16].mxu1 }
 0x59d   : > { %v1848_v55 = vadd.f32 %v1841_v52, %v1827_v54  ;;  %v1829_v56 = vpop.f32.mrb[17].mxu1 }
 0x59e   : > { %v1849_v57 = vadd.f32 %v1845_v53, %v1829_v56  ;;  %v1831_v58 = vpop.f32.mrb[18].mxu1 }
 0x59f   : > { %1852 = vst [vmem:[%s379_s27] sm:$0xff] %v1848_v55  ;;  %v1850_v7 = vadd.f32 %v1841_v52, %v1831_v58  ;;  %v1833_v8 = vpop.f32.mrb[19].mxu1 }
 0x5a0   : > { %1853 = vst [vmem:[%s379_s27 + $0x8] sm:$0xff] %v1849_v57  ;;  %v1851_v59 = vadd.f32 %v1845_v53, %v1833_v8 }
 0x5a1   : > { %1854 = vst [vmem:[%s379_s27 + $0x10] sm:$0xff] %v1850_v7 }
 0x5a2   : > { %1855 = vst [vmem:[%s379_s27 + $0x18] sm:$0xff] %v1851_v59 }
 0x5a3 PF: > { %s20_s13 = sadd.s32 1, %s2521_s13  }
 0x5a4   : > { %p17_p4 = scmp.ge.s32.totalorder %s20_s13, 4  }
 0x5a6   :  { %19 = sbr.rel (!%p17_p4) target bundleno = 1 (0x1), region = 99 }

</bundles_post_ra>
